<compile_context>
chip_gen: v6e
topology: v6e:2x2x1
jax: 0.10.0
libtpu: 0.0.40
codegen_flags: <defaults>
</compile_context>

<pallas_src>
import functools

import jax
import jax.numpy as jnp
from jax import lax
from jax.experimental import pallas as pl
from jax.experimental.pallas import tpu as pltpu

NUM_LAYERS = 2
_UNROLL_THRESHOLD = 8  # chunks up to this length are fully unrolled with static indices


def _cell_tail(gates, c_prev):
    """Elementwise LSTM cell math. Gate layout is (i, f, o, g): one wide sigmoid over the
    first 3 gate blocks, one tanh over the last (2 EUP invocations per layer)."""
    hp = gates.shape[-1] // 4
    sig = jax.nn.sigmoid(gates[:, :3 * hp])
    i = sig[:, 0 * hp:1 * hp]
    f = sig[:, 1 * hp:2 * hp]
    o = sig[:, 2 * hp:3 * hp]
    g = jnp.tanh(gates[:, 3 * hp:])
    c_new = f * c_prev + i * g
    h_new = o * jnp.tanh(c_new)
    return h_new, c_new


def lstm_kernel(xg_ref, keep_ref, h0_ref, c0_ref,
                whh0_ref, wih1_ref, whh1_ref, b1_ref,
                out_ref, hN_ref, cN_ref,
                *, hp, t_chunk, batch_tile):
    c_idx = pl.program_id(1)  # time-chunk index (serial / "arbitrary" axis)

    # Recurrent state lives in the resident hN/cN output blocks across the time axis;
    # initialize them once per batch tile.
    @pl.when(c_idx == 0)
    def _():
        hN_ref[...] = h0_ref[...]
        cN_ref[...] = c0_ref[...]

    whh0 = whh0_ref[...]   # (Hp, 4Hp) bf16
    wih1 = wih1_ref[...]   # (Hp, 4Hp) bf16
    whh1 = whh1_ref[...]   # (Hp, 4Hp) bf16
    # Hoisted invariant broadcast: one (B, 4Hp) bias per chunk, not per step.
    b1 = jnp.broadcast_to(b1_ref[...], (batch_tile, 4 * hp))

    def step(s, carry):
        h0p, c0p, h1p, c1p = carry
        # Layer-1 recurrent matmul first: it depends only on step s-1 state, so it can
        # overlap with layer-0's matmul + cell tail (un-fused from W_ih_l1).
        g1_hh = jnp.dot(h1p.astype(jnp.bfloat16), whh1,
                        preferred_element_type=jnp.float32)

        # Layer 0: only the recurrent matmul remains on the serial path.
        g0 = xg_ref[s].astype(jnp.float32) + jnp.dot(
            h0p.astype(jnp.bfloat16), whh0, preferred_element_type=jnp.float32)
        h0n, c0n = _cell_tail(g0, c0p)

        # Layer 1: only h0_new @ W_ih_l1 is serialized behind layer 0.
        g1 = g1_hh + b1 + jnp.dot(
            h0n.astype(jnp.bfloat16), wih1, preferred_element_type=jnp.float32)
        h1n, c1n = _cell_tail(g1, c1p)

        # Output is the top-layer hidden BEFORE the keep-mask (module semantics).
        out_ref[s] = h1n

        # keep-mask zeroes the carried memory for reset environments; broadcast once,
        # reuse for all four multiplies.
        keep = jnp.broadcast_to(keep_ref[s], (batch_tile, hp))
        return (keep * h0n, keep * c0n, keep * h1n, keep * c1n)

    # Register-resident state across the chunk: read hN/cN once, write once at the end.
    carry = (hN_ref[0], cN_ref[0], hN_ref[1], cN_ref[1])
    if t_chunk <= _UNROLL_THRESHOLD:
        for s in range(t_chunk):          # fully unrolled, static indices
            carry = step(s, carry)
    else:
        carry = lax.fori_loop(0, t_chunk, step, carry, unroll=8)

    h0f, c0f, h1f, c1f = carry
    hN_ref[0] = h0f
    hN_ref[1] = h1f
    cN_ref[0] = c0f
    cN_ref[1] = c1f


def _largest_divisor_le(n, cap):
    for d in range(min(n, cap), 0, -1):
        if n % d == 0:
            return d
    return 1


def _reorder_pad_gates(w, hidden, hp):
    """Reorder PyTorch gate blocks (i, f, g, o) -> (i, f, o, g) along the last axis and
    zero-pad each gate block from `hidden` to `hp` columns (lane-dense gate slices)."""
    i, f, g, o = jnp.split(w, 4, axis=-1)
    pad_width = [(0, 0)] * (w.ndim - 1) + [(0, hp - hidden)]
    return jnp.concatenate([jnp.pad(b, pad_width) for b in (i, f, o, g)], axis=-1)


def _pad_rows(w, hidden, hp):
    return jnp.pad(w, [(0, hp - hidden), (0, 0)])


def lstm_forward(x, params, mem=None, reset_flags=None, *,
                 t_chunk=None, batch_tile=None):
    """x: (seq, batch, input_size); mem: (num_layers, batch, 2*hidden) or None;
    reset_flags: (seq, batch) or None.  Returns (outputs, new_mem)."""
    seq, batch, input_size = x.shape
    hidden = params["w_hh_l0"].shape[1]
    # Pad hidden to a multiple of 128 so gate slices and state stores are lane-dense
    # whole-vreg accesses.  Padded lanes are exactly 0 throughout (zero weights/bias
    # rows+cols, zero initial state), so results are unchanged.
    hp = -(-hidden // 128) * 128

    if mem is None:
        h0 = jnp.zeros((NUM_LAYERS, batch, hp), jnp.float32)
        c0 = jnp.zeros((NUM_LAYERS, batch, hp), jnp.float32)
    else:
        h0 = jnp.pad(mem[..., :hidden].astype(jnp.float32),
                     [(0, 0), (0, 0), (0, hp - hidden)])
        c0 = jnp.pad(mem[..., hidden:].astype(jnp.float32),
                     [(0, 0), (0, 0), (0, hp - hidden)])

    if reset_flags is None:
        keep = jnp.ones((seq, batch, 1), jnp.float32)
    else:
        keep = (1.0 - reset_flags.astype(jnp.float32)).reshape(seq, batch, 1)

    # ---- weight prep (wrapper glue) -------------------------------------------------
    # Gate reorder (i,f,g,o)->(i,f,o,g) + lane padding applied uniformly to all weights
    # and biases so the kernel's (i,f,o | g) activation split is consistent.
    wih0 = _reorder_pad_gates(params["w_ih_l0"].T.astype(jnp.float32), hidden, hp)  # (I, 4Hp)
    b0 = _reorder_pad_gates((params["b_ih_l0"] + params["b_hh_l0"]).astype(jnp.float32),
                            hidden, hp)                                             # (4Hp,)

    # Hoisted layer-0 input projection: one big parallel matmul over seq*batch rows,
    # bf16 operands / f32 accumulate, streamed to the kernel as bf16.
    xg = (jnp.dot(x.reshape(seq * batch, input_size).astype(jnp.bfloat16),
                  wih0.astype(jnp.bfloat16),
                  preferred_element_type=jnp.float32) + b0)
    xg = xg.astype(jnp.bfloat16).reshape(seq, batch, 4 * hp)

    # Recurrent weights in bf16 (MXU-native); layer-1 ih and hh kept SEPARATE so the
    # hh matmul can be issued off the serial path.
    whh0 = _pad_rows(_reorder_pad_gates(params["w_hh_l0"].T, hidden, hp),
                     hidden, hp).astype(jnp.bfloat16)                               # (Hp, 4Hp)
    wih1 = _pad_rows(_reorder_pad_gates(params["w_ih_l1"].T, hidden, hp),
                     hidden, hp).astype(jnp.bfloat16)                               # (Hp, 4Hp)
    whh1 = _pad_rows(_reorder_pad_gates(params["w_hh_l1"].T, hidden, hp),
                     hidden, hp).astype(jnp.bfloat16)                               # (Hp, 4Hp)
    b1 = _reorder_pad_gates((params["b_ih_l1"] + params["b_hh_l1"]).astype(jnp.float32),
                            hidden, hp).reshape(1, 4 * hp)                          # (1, 4Hp)

    # ---- tiling ---------------------------------------------------------------------
    if t_chunk is None:
        t_chunk = _largest_divisor_le(seq, 64)   # amortize ~600-cycle per-grid-step cost
    assert seq % t_chunk == 0, "t_chunk must divide seq"
    n_chunks = seq // t_chunk

    # batch_tile < batch requires batch_tile % 8 == 0 (sublane tiling).  On v7x use
    # batch_tile = batch // 2 (when batch >= 16) to shard the leading "parallel" axis
    # across both TensorCores.
    if batch_tile is None:
        batch_tile = batch
    assert batch % batch_tile == 0, "batch_tile must divide batch"
    if batch_tile != batch:
        assert batch_tile % 8 == 0, "partial batch tiles must be a multiple of 8"
    n_btiles = batch // batch_tile

    out_shape = (
        jax.ShapeDtypeStruct((seq, batch, hp), jnp.float32),
        jax.ShapeDtypeStruct((NUM_LAYERS, batch, hp), jnp.float32),
        jax.ShapeDtypeStruct((NUM_LAYERS, batch, hp), jnp.float32),
    )

    grid_spec = pltpu.PrefetchScalarGridSpec(
        num_scalar_prefetch=0,
        grid=(n_btiles, n_chunks),
        in_specs=[
            pl.BlockSpec((t_chunk, batch_tile, 4 * hp), lambda b, c: (c, b, 0)),   # xg chunk (bf16)
            pl.BlockSpec((t_chunk, batch_tile, 1), lambda b, c: (c, b, 0)),        # keep chunk
            pl.BlockSpec((NUM_LAYERS, batch_tile, hp), lambda b, c: (0, b, 0)),    # h0
            pl.BlockSpec((NUM_LAYERS, batch_tile, hp), lambda b, c: (0, b, 0)),    # c0
            pl.BlockSpec((hp, 4 * hp), lambda b, c: (0, 0)),                       # W_hh l0
            pl.BlockSpec((hp, 4 * hp), lambda b, c: (0, 0)),                       # W_ih l1
            pl.BlockSpec((hp, 4 * hp), lambda b, c: (0, 0)),                       # W_hh l1
            pl.BlockSpec((1, 4 * hp), lambda b, c: (0, 0)),                        # b l1
        ],
        out_specs=[
            pl.BlockSpec((t_chunk, batch_tile, hp), lambda b, c: (c, b, 0)),       # outputs
            pl.BlockSpec((NUM_LAYERS, batch_tile, hp), lambda b, c: (0, b, 0)),    # h final
            pl.BlockSpec((NUM_LAYERS, batch_tile, hp), lambda b, c: (0, b, 0)),    # c final
        ],
        scratch_shapes=[],
    )

    outs, hN, cN = pl.pallas_call(
        functools.partial(lstm_kernel, hp=hp, t_chunk=t_chunk, batch_tile=batch_tile),
        out_shape=out_shape,
        grid_spec=grid_spec,
        # h0 -> hN, c0 -> cN alias: the final state overwrites the (wrapper-created,
        # donatable) padded initial-state buffers.  Only safe because the BlockSpecs /
        # index maps of h0/c0 and hN/cN are identical.
        input_output_aliases={2: 1, 3: 2},
        compiler_params=pltpu.CompilerParams(
            # batch tiles are independent ("parallel", megacore-shardable on v7x);
            # the time axis carries the recurrence and MUST stay "arbitrary".
            dimension_semantics=("parallel", "arbitrary"),
            # NOTE: on v7x (64 MiB physical VMEM) re-derive this when scaling
            # t_chunk / batch_tile; the bf16 xg chunk is the dominant term.
            vmem_limit_bytes=32 * 1024 * 1024,
        ),
    )(xg, keep, h0, c0, whh0, wih1, whh1, b1)

    outputs = outs[..., :hidden]
    new_mem = jnp.concatenate([hN[..., :hidden], cN[..., :hidden]], axis=-1)
    return outputs, new_mem


def lstm_ref(x, params, mem, reset_flags, hidden):
    """Pure-JAX f32 reference mirroring the PyTorch module semantics."""
    seq = x.shape[0]
    h = mem[..., :hidden]
    c = mem[..., hidden:]
    keep_flags = 1.0 - reset_flags
    outs = []
    for t in range(seq):
        inp = x[t]
        h_new, c_new = [], []
        for l in range(NUM_LAYERS):
            w_ih = params[f"w_ih_l{l}"]
            w_hh = params[f"w_hh_l{l}"]
            b = params[f"b_ih_l{l}"] + params[f"b_hh_l{l}"]
            g = inp @ w_ih.T + h[l] @ w_hh.T + b
            i = jax.nn.sigmoid(g[:, :hidden])
            f = jax.nn.sigmoid(g[:, hidden:2 * hidden])
            gg = jnp.tanh(g[:, 2 * hidden:3 * hidden])
            o = jax.nn.sigmoid(g[:, 3 * hidden:])
            cn = f * c[l] + i * gg
            hn = o * jnp.tanh(cn)
            h_new.append(hn)
            c_new.append(cn)
            inp = hn
        outs.append(inp)
        k = keep_flags[t][:, None]
        h = k * jnp.stack(h_new)
        c = k * jnp.stack(c_new)
    return jnp.stack(outs), jnp.concatenate([h, c], axis=-1)


def init_params(key, input_size, hidden):
    """Deterministic synthetic nn.LSTM parameters (uniform(-1/sqrt(H), 1/sqrt(H)))."""
    bound = 1.0 / jnp.sqrt(jnp.float32(hidden))
    shapes = {
        "w_ih_l0": (4 * hidden, input_size),
        "w_hh_l0": (4 * hidden, hidden),
        "b_ih_l0": (4 * hidden,),
        "b_hh_l0": (4 * hidden,),
        "w_ih_l1": (4 * hidden, hidden),
        "w_hh_l1": (4 * hidden, hidden),
        "b_ih_l1": (4 * hidden,),
        "b_hh_l1": (4 * hidden,),
    }
    params = {}
    keys = jax.random.split(key, len(shapes))
    for k, (name, shp) in zip(keys, shapes.items()):
        params[name] = jax.random.uniform(k, shp, jnp.float32, -bound, bound)
    return params


if __name__ == "__main__":
    key = jax.random.PRNGKey(0)
    k_p, k_x, k_m, k_r, k_x2, k_m2, k_r2 = jax.random.split(key, 7)

    seq, batch, input_size, hidden = 8, 2, 16, 32
    params = init_params(k_p, input_size, hidden)

    # Tolerances account for bf16 MXU operands and bf16-streamed xg (reference is f32).
    ATOL = RTOL = 3e-2

    # --- test 1: t_chunk=4 -> 2 time chunks; exercises the cross-chunk resident-state
    # carry and the fully-unrolled (static-index) step loop.
    x = jax.random.normal(k_x, (seq, batch, input_size), jnp.float32)
    mem = 0.1 * jax.random.normal(k_m, (NUM_LAYERS, batch, 2 * hidden), jnp.float32)
    reset_flags = jax.random.bernoulli(k_r, 0.25, (seq, batch)).astype(jnp.float32)

    outs, new_mem = lstm_forward(x, params, mem, reset_flags, t_chunk=4)
    outs = jax.block_until_ready(outs)
    new_mem = jax.block_until_ready(new_mem)

    outs_ref, mem_ref = lstm_ref(x, params, mem, reset_flags, hidden)
    assert outs.shape == (seq, batch, hidden)
    assert new_mem.shape == (NUM_LAYERS, batch, 2 * hidden)
    assert jnp.allclose(outs, outs_ref, atol=ATOL, rtol=RTOL)
    assert jnp.allclose(new_mem, mem_ref, atol=ATOL, rtol=RTOL)

    # --- test 2: longer sequence with the default t_chunk (=32); exercises the
    # lax.fori_loop(unroll=8) register-carried step loop.
    seq2 = 32
    x2 = jax.random.normal(k_x2, (seq2, batch, input_size), jnp.float32)
    mem2 = 0.1 * jax.random.normal(k_m2, (NUM_LAYERS, batch, 2 * hidden), jnp.float32)
    rf2 = jax.random.bernoulli(k_r2, 0.25, (seq2, batch)).astype(jnp.float32)

    outs2, new_mem2 = lstm_forward(x2, params, mem2, rf2)
    outs2 = jax.block_until_ready(outs2)
    new_mem2 = jax.block_until_ready(new_mem2)

    outs2_ref, mem2_ref = lstm_ref(x2, params, mem2, rf2, hidden)
    assert jnp.allclose(outs2, outs2_ref, atol=ATOL, rtol=RTOL)
    assert jnp.allclose(new_mem2, mem2_ref, atol=ATOL, rtol=RTOL)

    print("KERNEL_OK")
</pallas_src>

<mosaic_0001>
module attributes {stable_mosaic.version = 11 : i64} {
  func.func @lstm_kernel(%arg0: i32, %arg1: i32, %arg2: memref<4x2x512xbf16, #tpu.memory_space<vmem>>, %arg3: memref<4x2x1xf32, #tpu.memory_space<vmem>>, %arg4: memref<2x2x128xf32, #tpu.memory_space<vmem>>, %arg5: memref<2x2x128xf32, #tpu.memory_space<vmem>>, %arg6: memref<128x512xbf16, #tpu.memory_space<vmem>>, %arg7: memref<128x512xbf16, #tpu.memory_space<vmem>>, %arg8: memref<128x512xbf16, #tpu.memory_space<vmem>>, %arg9: memref<1x512xf32, #tpu.memory_space<vmem>>, %arg10: memref<4x2x128xf32, #tpu.memory_space<vmem>>, %arg11: memref<2x2x128xf32, #tpu.memory_space<vmem>>, %arg12: memref<2x2x128xf32, #tpu.memory_space<vmem>>) attributes {dimension_semantics = [#tpu.dimension_semantics<parallel>, #tpu.dimension_semantics<arbitrary>], iteration_bounds = array<i64: 1, 2>, scalar_prefetch = 0 : i64, scratch_operands = 0 : i64, tpu.core_type = #tpu.core_type<tc>, window_params = [{transform_indices = @transform_0, window_bounds = array<i64: 4, 2, 512>}, {transform_indices = @transform_1, window_bounds = array<i64: 4, 2, 1>}, {transform_indices = @transform_2, window_bounds = array<i64: 2, 2, 128>}, {transform_indices = @transform_3, window_bounds = array<i64: 2, 2, 128>}, {pipeline_mode = #tpu.pipeline_mode<synchronous>, transform_indices = @transform_4, window_bounds = array<i64: 128, 512>}, {pipeline_mode = #tpu.pipeline_mode<synchronous>, transform_indices = @transform_5, window_bounds = array<i64: 128, 512>}, {pipeline_mode = #tpu.pipeline_mode<synchronous>, transform_indices = @transform_6, window_bounds = array<i64: 128, 512>}, {pipeline_mode = #tpu.pipeline_mode<synchronous>, transform_indices = @transform_7, window_bounds = array<i64: 1, 512>}, {transform_indices = @transform_8, window_bounds = array<i64: 4, 2, 128>}, {transform_indices = @transform_9, window_bounds = array<i64: 2, 2, 128>}, {transform_indices = @transform_10, window_bounds = array<i64: 2, 2, 128>}]} {
    %c0_i32 = arith.constant 0 : i32
    %0 = arith.cmpi eq, %arg1, %c0_i32 : i32
    %1 = arith.extui %0 : i1 to i32
    %c0_i32_0 = arith.constant 0 : i32
    %2 = arith.cmpi ne, %1, %c0_i32_0 : i32
    scf.if %2 {
      %c0_84 = arith.constant 0 : index
      %c0_85 = arith.constant 0 : index
      %c0_86 = arith.constant 0 : index
      %249 = vector.load %arg4[%c0_84, %c0_85, %c0_86] : memref<2x2x128xf32, #tpu.memory_space<vmem>>, vector<2x2x128xf32>
      %c0_87 = arith.constant 0 : index
      %c0_88 = arith.constant 0 : index
      %c0_89 = arith.constant 0 : index
      %250 = vector.load %arg11[%c0_87, %c0_88, %c0_89] : memref<2x2x128xf32, #tpu.memory_space<vmem>>, vector<2x2x128xf32>
      tpu.vector_store %arg11[%c0_87, %c0_88, %c0_89], %249 {strides = array<i32>} : memref<2x2x128xf32, #tpu.memory_space<vmem>>, vector<2x2x128xf32>,
      %c0_90 = arith.constant 0 : index
      %c0_91 = arith.constant 0 : index
      %c0_92 = arith.constant 0 : index
      %251 = vector.load %arg5[%c0_90, %c0_91, %c0_92] : memref<2x2x128xf32, #tpu.memory_space<vmem>>, vector<2x2x128xf32>
      %c0_93 = arith.constant 0 : index
      %c0_94 = arith.constant 0 : index
      %c0_95 = arith.constant 0 : index
      %252 = vector.load %arg12[%c0_93, %c0_94, %c0_95] : memref<2x2x128xf32, #tpu.memory_space<vmem>>, vector<2x2x128xf32>
      tpu.vector_store %arg12[%c0_93, %c0_94, %c0_95], %251 {strides = array<i32>} : memref<2x2x128xf32, #tpu.memory_space<vmem>>, vector<2x2x128xf32>,
    } else {
    }
    %c0 = arith.constant 0 : index
    %c0_1 = arith.constant 0 : index
    %3 = vector.load %arg6[%c0, %c0_1] : memref<128x512xbf16, #tpu.memory_space<vmem>>, vector<128x512xbf16>
    %c0_2 = arith.constant 0 : index
    %c0_3 = arith.constant 0 : index
    %4 = vector.load %arg7[%c0_2, %c0_3] : memref<128x512xbf16, #tpu.memory_space<vmem>>, vector<128x512xbf16>
    %c0_4 = arith.constant 0 : index
    %c0_5 = arith.constant 0 : index
    %5 = vector.load %arg8[%c0_4, %c0_5] : memref<128x512xbf16, #tpu.memory_space<vmem>>, vector<128x512xbf16>
    %c0_6 = arith.constant 0 : index
    %c0_7 = arith.constant 0 : index
    %6 = vector.load %arg9[%c0_6, %c0_7] : memref<1x512xf32, #tpu.memory_space<vmem>>, vector<1x512xf32>
    %7 = vector.shape_cast %6 : vector<1x512xf32> to vector<1x512xf32>
    %8 = vector.broadcast %7 : vector<1x512xf32> to vector<2x512xf32>
    %c0_8 = arith.constant 0 : index
    %c0_9 = arith.constant 0 : index
    %c0_10 = arith.constant 0 : index
    %9 = vector.load %arg11[%c0_8, %c0_9, %c0_10] : memref<2x2x128xf32, #tpu.memory_space<vmem>>, vector<1x2x128xf32>
    %10 = vector.shape_cast %9 : vector<1x2x128xf32> to vector<2x128xf32>
    %c0_11 = arith.constant 0 : index
    %c0_12 = arith.constant 0 : index
    %c0_13 = arith.constant 0 : index
    %11 = vector.load %arg12[%c0_11, %c0_12, %c0_13] : memref<2x2x128xf32, #tpu.memory_space<vmem>>, vector<1x2x128xf32>
    %12 = vector.shape_cast %11 : vector<1x2x128xf32> to vector<2x128xf32>
    %c1 = arith.constant 1 : index
    %c0_14 = arith.constant 0 : index
    %c0_15 = arith.constant 0 : index
    %13 = vector.load %arg11[%c1, %c0_14, %c0_15] : memref<2x2x128xf32, #tpu.memory_space<vmem>>, vector<1x2x128xf32>
    %14 = vector.shape_cast %13 : vector<1x2x128xf32> to vector<2x128xf32>
    %c1_16 = arith.constant 1 : index
    %c0_17 = arith.constant 0 : index
    %c0_18 = arith.constant 0 : index
    %15 = vector.load %arg12[%c1_16, %c0_17, %c0_18] : memref<2x2x128xf32, #tpu.memory_space<vmem>>, vector<1x2x128xf32>
    %16 = vector.shape_cast %15 : vector<1x2x128xf32> to vector<2x128xf32>
    %17 = arith.truncf %14 : vector<2x128xf32> to vector<2x128xbf16>
    %cst = arith.constant dense<0.000000e+00> : vector<2x512xf32>
    %18 = tpu.matmul %17, %5, %cst {dimension_numbers = #tpu.dot_dimension_numbers<[1], [0], [0], [1], [0, 0, 1, 1], [], []>} : vector<2x128xbf16>, vector<128x512xbf16>, vector<2x512xf32> -> vector<2x512xf32>
    %c0_19 = arith.constant 0 : index
    %c0_20 = arith.constant 0 : index
    %c0_21 = arith.constant 0 : index
    %19 = vector.load %arg2[%c0_19, %c0_20, %c0_21] : memref<4x2x512xbf16, #tpu.memory_space<vmem>>, vector<1x2x512xbf16>
    %20 = vector.shape_cast %19 : vector<1x2x512xbf16> to vector<2x512xbf16>
    %21 = arith.extf %20 : vector<2x512xbf16> to vector<2x512xf32>
    %22 = arith.truncf %10 : vector<2x128xf32> to vector<2x128xbf16>
    %cst_22 = arith.constant dense<0.000000e+00> : vector<2x512xf32>
    %23 = tpu.matmul %22, %3, %cst_22 {dimension_numbers = #tpu.dot_dimension_numbers<[1], [0], [0], [1], [0, 0, 1, 1], [], []>} : vector<2x128xbf16>, vector<128x512xbf16>, vector<2x512xf32> -> vector<2x512xf32>
    %24 = arith.addf %21, %23 : vector<2x512xf32>
    %25 = vector.extract_strided_slice %24 {offsets = [0, 0], sizes = [2, 384], strides = [1, 1]} : vector<2x512xf32> to vector<2x384xf32>
    %26 = arith.negf %25 : vector<2x384xf32>
    %27 = math.exp %26 : vector<2x384xf32>
    %cst_23 = arith.constant 1.000000e+00 : f32
    %28 = vector.broadcast %cst_23 : f32 to vector<2x384xf32>
    %29 = arith.addf %28, %27 : vector<2x384xf32>
    %30 = arith.divf %28, %29 : vector<2x384xf32>
    %31 = vector.extract_strided_slice %30 {offsets = [0, 0], sizes = [2, 128], strides = [1, 1]} : vector<2x384xf32> to vector<2x128xf32>
    %32 = vector.extract_strided_slice %30 {offsets = [0, 128], sizes = [2, 128], strides = [1, 1]} : vector<2x384xf32> to vector<2x128xf32>
    %33 = vector.extract_strided_slice %30 {offsets = [0, 256], sizes = [2, 128], strides = [1, 1]} : vector<2x384xf32> to vector<2x128xf32>
    %34 = vector.extract_strided_slice %24 {offsets = [0, 384], sizes = [2, 128], strides = [1, 1]} : vector<2x512xf32> to vector<2x128xf32>
    %35 = math.tanh %34 : vector<2x128xf32>
    %36 = arith.mulf %32, %12 : vector<2x128xf32>
    %37 = arith.mulf %31, %35 : vector<2x128xf32>
    %38 = arith.addf %36, %37 : vector<2x128xf32>
    %39 = math.tanh %38 : vector<2x128xf32>
    %40 = arith.mulf %33, %39 : vector<2x128xf32>
    %41 = arith.addf %18, %8 : vector<2x512xf32>
    %42 = arith.truncf %40 : vector<2x128xf32> to vector<2x128xbf16>
    %cst_24 = arith.constant dense<0.000000e+00> : vector<2x512xf32>
    %43 = tpu.matmul %42, %4, %cst_24 {dimension_numbers = #tpu.dot_dimension_numbers<[1], [0], [0], [1], [0, 0, 1, 1], [], []>} : vector<2x128xbf16>, vector<128x512xbf16>, vector<2x512xf32> -> vector<2x512xf32>
    %44 = arith.addf %41, %43 : vector<2x512xf32>
    %45 = vector.extract_strided_slice %44 {offsets = [0, 0], sizes = [2, 384], strides = [1, 1]} : vector<2x512xf32> to vector<2x384xf32>
    %46 = arith.negf %45 : vector<2x384xf32>
    %47 = math.exp %46 : vector<2x384xf32>
    %cst_25 = arith.constant 1.000000e+00 : f32
    %48 = vector.broadcast %cst_25 : f32 to vector<2x384xf32>
    %49 = arith.addf %48, %47 : vector<2x384xf32>
    %50 = arith.divf %48, %49 : vector<2x384xf32>
    %51 = vector.extract_strided_slice %50 {offsets = [0, 0], sizes = [2, 128], strides = [1, 1]} : vector<2x384xf32> to vector<2x128xf32>
    %52 = vector.extract_strided_slice %50 {offsets = [0, 128], sizes = [2, 128], strides = [1, 1]} : vector<2x384xf32> to vector<2x128xf32>
    %53 = vector.extract_strided_slice %50 {offsets = [0, 256], sizes = [2, 128], strides = [1, 1]} : vector<2x384xf32> to vector<2x128xf32>
    %54 = vector.extract_strided_slice %44 {offsets = [0, 384], sizes = [2, 128], strides = [1, 1]} : vector<2x512xf32> to vector<2x128xf32>
    %55 = math.tanh %54 : vector<2x128xf32>
    %56 = arith.mulf %52, %16 : vector<2x128xf32>
    %57 = arith.mulf %51, %55 : vector<2x128xf32>
    %58 = arith.addf %56, %57 : vector<2x128xf32>
    %59 = math.tanh %58 : vector<2x128xf32>
    %60 = arith.mulf %53, %59 : vector<2x128xf32>
    %c0_26 = arith.constant 0 : index
    %c0_27 = arith.constant 0 : index
    %c0_28 = arith.constant 0 : index
    %61 = vector.load %arg10[%c0_26, %c0_27, %c0_28] : memref<4x2x128xf32, #tpu.memory_space<vmem>>, vector<1x2x128xf32>
    %62 = vector.shape_cast %61 : vector<1x2x128xf32> to vector<2x128xf32>
    %63 = vector.shape_cast %60 : vector<2x128xf32> to vector<1x2x128xf32>
    tpu.vector_store %arg10[%c0_26, %c0_27, %c0_28], %63 {strides = array<i32>} : memref<4x2x128xf32, #tpu.memory_space<vmem>>, vector<1x2x128xf32>,
    %c0_29 = arith.constant 0 : index
    %c0_30 = arith.constant 0 : index
    %c0_31 = arith.constant 0 : index
    %64 = vector.load %arg3[%c0_29, %c0_30, %c0_31] : memref<4x2x1xf32, #tpu.memory_space<vmem>>, vector<1x2x1xf32>
    %65 = vector.shape_cast %64 : vector<1x2x1xf32> to vector<2x1xf32>
    %66 = vector.shape_cast %65 : vector<2x1xf32> to vector<2x1xf32>
    %67 = vector.broadcast %66 : vector<2x1xf32> to vector<2x128xf32>
    %68 = arith.mulf %67, %40 : vector<2x128xf32>
    %69 = arith.mulf %67, %38 : vector<2x128xf32>
    %70 = arith.mulf %67, %60 : vector<2x128xf32>
    %71 = arith.mulf %67, %58 : vector<2x128xf32>
    %72 = arith.truncf %70 : vector<2x128xf32> to vector<2x128xbf16>
    %cst_32 = arith.constant dense<0.000000e+00> : vector<2x512xf32>
    %73 = tpu.matmul %72, %5, %cst_32 {dimension_numbers = #tpu.dot_dimension_numbers<[1], [0], [0], [1], [0, 0, 1, 1], [], []>} : vector<2x128xbf16>, vector<128x512xbf16>, vector<2x512xf32> -> vector<2x512xf32>
    %c1_33 = arith.constant 1 : index
    %c0_34 = arith.constant 0 : index
    %c0_35 = arith.constant 0 : index
    %74 = vector.load %arg2[%c1_33, %c0_34, %c0_35] : memref<4x2x512xbf16, #tpu.memory_space<vmem>>, vector<1x2x512xbf16>
    %75 = vector.shape_cast %74 : vector<1x2x512xbf16> to vector<2x512xbf16>
    %76 = arith.extf %75 : vector<2x512xbf16> to vector<2x512xf32>
    %77 = arith.truncf %68 : vector<2x128xf32> to vector<2x128xbf16>
    %cst_36 = arith.constant dense<0.000000e+00> : vector<2x512xf32>
    %78 = tpu.matmul %77, %3, %cst_36 {dimension_numbers = #tpu.dot_dimension_numbers<[1], [0], [0], [1], [0, 0, 1, 1], [], []>} : vector<2x128xbf16>, vector<128x512xbf16>, vector<2x512xf32> -> vector<2x512xf32>
    %79 = arith.addf %76, %78 : vector<2x512xf32>
    %80 = vector.extract_strided_slice %79 {offsets = [0, 0], sizes = [2, 384], strides = [1, 1]} : vector<2x512xf32> to vector<2x384xf32>
    %81 = arith.negf %80 : vector<2x384xf32>
    %82 = math.exp %81 : vector<2x384xf32>
    %cst_37 = arith.constant 1.000000e+00 : f32
    %83 = vector.broadcast %cst_37 : f32 to vector<2x384xf32>
    %84 = arith.addf %83, %82 : vector<2x384xf32>
    %85 = arith.divf %83, %84 : vector<2x384xf32>
    %86 = vector.extract_strided_slice %85 {offsets = [0, 0], sizes = [2, 128], strides = [1, 1]} : vector<2x384xf32> to vector<2x128xf32>
    %87 = vector.extract_strided_slice %85 {offsets = [0, 128], sizes = [2, 128], strides = [1, 1]} : vector<2x384xf32> to vector<2x128xf32>
    %88 = vector.extract_strided_slice %85 {offsets = [0, 256], sizes = [2, 128], strides = [1, 1]} : vector<2x384xf32> to vector<2x128xf32>
    %89 = vector.extract_strided_slice %79 {offsets = [0, 384], sizes = [2, 128], strides = [1, 1]} : vector<2x512xf32> to vector<2x128xf32>
    %90 = math.tanh %89 : vector<2x128xf32>
    %91 = arith.mulf %87, %69 : vector<2x128xf32>
    %92 = arith.mulf %86, %90 : vector<2x128xf32>
    %93 = arith.addf %91, %92 : vector<2x128xf32>
    %94 = math.tanh %93 : vector<2x128xf32>
    %95 = arith.mulf %88, %94 : vector<2x128xf32>
    %96 = arith.addf %73, %8 : vector<2x512xf32>
    %97 = arith.truncf %95 : vector<2x128xf32> to vector<2x128xbf16>
    %cst_38 = arith.constant dense<0.000000e+00> : vector<2x512xf32>
    %98 = tpu.matmul %97, %4, %cst_38 {dimension_numbers = #tpu.dot_dimension_numbers<[1], [0], [0], [1], [0, 0, 1, 1], [], []>} : vector<2x128xbf16>, vector<128x512xbf16>, vector<2x512xf32> -> vector<2x512xf32>
    %99 = arith.addf %96, %98 : vector<2x512xf32>
    %100 = vector.extract_strided_slice %99 {offsets = [0, 0], sizes = [2, 384], strides = [1, 1]} : vector<2x512xf32> to vector<2x384xf32>
    %101 = arith.negf %100 : vector<2x384xf32>
    %102 = math.exp %101 : vector<2x384xf32>
    %cst_39 = arith.constant 1.000000e+00 : f32
    %103 = vector.broadcast %cst_39 : f32 to vector<2x384xf32>
    %104 = arith.addf %103, %102 : vector<2x384xf32>
    %105 = arith.divf %103, %104 : vector<2x384xf32>
    %106 = vector.extract_strided_slice %105 {offsets = [0, 0], sizes = [2, 128], strides = [1, 1]} : vector<2x384xf32> to vector<2x128xf32>
    %107 = vector.extract_strided_slice %105 {offsets = [0, 128], sizes = [2, 128], strides = [1, 1]} : vector<2x384xf32> to vector<2x128xf32>
    %108 = vector.extract_strided_slice %105 {offsets = [0, 256], sizes = [2, 128], strides = [1, 1]} : vector<2x384xf32> to vector<2x128xf32>
    %109 = vector.extract_strided_slice %99 {offsets = [0, 384], sizes = [2, 128], strides = [1, 1]} : vector<2x512xf32> to vector<2x128xf32>
    %110 = math.tanh %109 : vector<2x128xf32>
    %111 = arith.mulf %107, %71 : vector<2x128xf32>
    %112 = arith.mulf %106, %110 : vector<2x128xf32>
    %113 = arith.addf %111, %112 : vector<2x128xf32>
    %114 = math.tanh %113 : vector<2x128xf32>
    %115 = arith.mulf %108, %114 : vector<2x128xf32>
    %c1_40 = arith.constant 1 : index
    %c0_41 = arith.constant 0 : index
    %c0_42 = arith.constant 0 : index
    %116 = vector.load %arg10[%c1_40, %c0_41, %c0_42] : memref<4x2x128xf32, #tpu.memory_space<vmem>>, vector<1x2x128xf32>
    %117 = vector.shape_cast %116 : vector<1x2x128xf32> to vector<2x128xf32>
    %118 = vector.shape_cast %115 : vector<2x128xf32> to vector<1x2x128xf32>
    tpu.vector_store %arg10[%c1_40, %c0_41, %c0_42], %118 {strides = array<i32>} : memref<4x2x128xf32, #tpu.memory_space<vmem>>, vector<1x2x128xf32>,
    %c1_43 = arith.constant 1 : index
    %c0_44 = arith.constant 0 : index
    %c0_45 = arith.constant 0 : index
    %119 = vector.load %arg3[%c1_43, %c0_44, %c0_45] : memref<4x2x1xf32, #tpu.memory_space<vmem>>, vector<1x2x1xf32>
    %120 = vector.shape_cast %119 : vector<1x2x1xf32> to vector<2x1xf32>
    %121 = vector.shape_cast %120 : vector<2x1xf32> to vector<2x1xf32>
    %122 = vector.broadcast %121 : vector<2x1xf32> to vector<2x128xf32>
    %123 = arith.mulf %122, %95 : vector<2x128xf32>
    %124 = arith.mulf %122, %93 : vector<2x128xf32>
    %125 = arith.mulf %122, %115 : vector<2x128xf32>
    %126 = arith.mulf %122, %113 : vector<2x128xf32>
    %127 = arith.truncf %125 : vector<2x128xf32> to vector<2x128xbf16>
    %cst_46 = arith.constant dense<0.000000e+00> : vector<2x512xf32>
    %128 = tpu.matmul %127, %5, %cst_46 {dimension_numbers = #tpu.dot_dimension_numbers<[1], [0], [0], [1], [0, 0, 1, 1], [], []>} : vector<2x128xbf16>, vector<128x512xbf16>, vector<2x512xf32> -> vector<2x512xf32>
    %c2 = arith.constant 2 : index
    %c0_47 = arith.constant 0 : index
    %c0_48 = arith.constant 0 : index
    %129 = vector.load %arg2[%c2, %c0_47, %c0_48] : memref<4x2x512xbf16, #tpu.memory_space<vmem>>, vector<1x2x512xbf16>
    %130 = vector.shape_cast %129 : vector<1x2x512xbf16> to vector<2x512xbf16>
    %131 = arith.extf %130 : vector<2x512xbf16> to vector<2x512xf32>
    %132 = arith.truncf %123 : vector<2x128xf32> to vector<2x128xbf16>
    %cst_49 = arith.constant dense<0.000000e+00> : vector<2x512xf32>
    %133 = tpu.matmul %132, %3, %cst_49 {dimension_numbers = #tpu.dot_dimension_numbers<[1], [0], [0], [1], [0, 0, 1, 1], [], []>} : vector<2x128xbf16>, vector<128x512xbf16>, vector<2x512xf32> -> vector<2x512xf32>
    %134 = arith.addf %131, %133 : vector<2x512xf32>
    %135 = vector.extract_strided_slice %134 {offsets = [0, 0], sizes = [2, 384], strides = [1, 1]} : vector<2x512xf32> to vector<2x384xf32>
    %136 = arith.negf %135 : vector<2x384xf32>
    %137 = math.exp %136 : vector<2x384xf32>
    %cst_50 = arith.constant 1.000000e+00 : f32
    %138 = vector.broadcast %cst_50 : f32 to vector<2x384xf32>
    %139 = arith.addf %138, %137 : vector<2x384xf32>
    %140 = arith.divf %138, %139 : vector<2x384xf32>
    %141 = vector.extract_strided_slice %140 {offsets = [0, 0], sizes = [2, 128], strides = [1, 1]} : vector<2x384xf32> to vector<2x128xf32>
    %142 = vector.extract_strided_slice %140 {offsets = [0, 128], sizes = [2, 128], strides = [1, 1]} : vector<2x384xf32> to vector<2x128xf32>
    %143 = vector.extract_strided_slice %140 {offsets = [0, 256], sizes = [2, 128], strides = [1, 1]} : vector<2x384xf32> to vector<2x128xf32>
    %144 = vector.extract_strided_slice %134 {offsets = [0, 384], sizes = [2, 128], strides = [1, 1]} : vector<2x512xf32> to vector<2x128xf32>
    %145 = math.tanh %144 : vector<2x128xf32>
    %146 = arith.mulf %142, %124 : vector<2x128xf32>
    %147 = arith.mulf %141, %145 : vector<2x128xf32>
    %148 = arith.addf %146, %147 : vector<2x128xf32>
    %149 = math.tanh %148 : vector<2x128xf32>
    %150 = arith.mulf %143, %149 : vector<2x128xf32>
    %151 = arith.addf %128, %8 : vector<2x512xf32>
    %152 = arith.truncf %150 : vector<2x128xf32> to vector<2x128xbf16>
    %cst_51 = arith.constant dense<0.000000e+00> : vector<2x512xf32>
    %153 = tpu.matmul %152, %4, %cst_51 {dimension_numbers = #tpu.dot_dimension_numbers<[1], [0], [0], [1], [0, 0, 1, 1], [], []>} : vector<2x128xbf16>, vector<128x512xbf16>, vector<2x512xf32> -> vector<2x512xf32>
    %154 = arith.addf %151, %153 : vector<2x512xf32>
    %155 = vector.extract_strided_slice %154 {offsets = [0, 0], sizes = [2, 384], strides = [1, 1]} : vector<2x512xf32> to vector<2x384xf32>
    %156 = arith.negf %155 : vector<2x384xf32>
    %157 = math.exp %156 : vector<2x384xf32>
    %cst_52 = arith.constant 1.000000e+00 : f32
    %158 = vector.broadcast %cst_52 : f32 to vector<2x384xf32>
    %159 = arith.addf %158, %157 : vector<2x384xf32>
    %160 = arith.divf %158, %159 : vector<2x384xf32>
    %161 = vector.extract_strided_slice %160 {offsets = [0, 0], sizes = [2, 128], strides = [1, 1]} : vector<2x384xf32> to vector<2x128xf32>
    %162 = vector.extract_strided_slice %160 {offsets = [0, 128], sizes = [2, 128], strides = [1, 1]} : vector<2x384xf32> to vector<2x128xf32>
    %163 = vector.extract_strided_slice %160 {offsets = [0, 256], sizes = [2, 128], strides = [1, 1]} : vector<2x384xf32> to vector<2x128xf32>
    %164 = vector.extract_strided_slice %154 {offsets = [0, 384], sizes = [2, 128], strides = [1, 1]} : vector<2x512xf32> to vector<2x128xf32>
    %165 = math.tanh %164 : vector<2x128xf32>
    %166 = arith.mulf %162, %126 : vector<2x128xf32>
    %167 = arith.mulf %161, %165 : vector<2x128xf32>
    %168 = arith.addf %166, %167 : vector<2x128xf32>
    %169 = math.tanh %168 : vector<2x128xf32>
    %170 = arith.mulf %163, %169 : vector<2x128xf32>
    %c2_53 = arith.constant 2 : index
    %c0_54 = arith.constant 0 : index
    %c0_55 = arith.constant 0 : index
    %171 = vector.load %arg10[%c2_53, %c0_54, %c0_55] : memref<4x2x128xf32, #tpu.memory_space<vmem>>, vector<1x2x128xf32>
    %172 = vector.shape_cast %171 : vector<1x2x128xf32> to vector<2x128xf32>
    %173 = vector.shape_cast %170 : vector<2x128xf32> to vector<1x2x128xf32>
    tpu.vector_store %arg10[%c2_53, %c0_54, %c0_55], %173 {strides = array<i32>} : memref<4x2x128xf32, #tpu.memory_space<vmem>>, vector<1x2x128xf32>,
    %c2_56 = arith.constant 2 : index
    %c0_57 = arith.constant 0 : index
    %c0_58 = arith.constant 0 : index
    %174 = vector.load %arg3[%c2_56, %c0_57, %c0_58] : memref<4x2x1xf32, #tpu.memory_space<vmem>>, vector<1x2x1xf32>
    %175 = vector.shape_cast %174 : vector<1x2x1xf32> to vector<2x1xf32>
    %176 = vector.shape_cast %175 : vector<2x1xf32> to vector<2x1xf32>
    %177 = vector.broadcast %176 : vector<2x1xf32> to vector<2x128xf32>
    %178 = arith.mulf %177, %150 : vector<2x128xf32>
    %179 = arith.mulf %177, %148 : vector<2x128xf32>
    %180 = arith.mulf %177, %170 : vector<2x128xf32>
    %181 = arith.mulf %177, %168 : vector<2x128xf32>
    %182 = arith.truncf %180 : vector<2x128xf32> to vector<2x128xbf16>
    %cst_59 = arith.constant dense<0.000000e+00> : vector<2x512xf32>
    %183 = tpu.matmul %182, %5, %cst_59 {dimension_numbers = #tpu.dot_dimension_numbers<[1], [0], [0], [1], [0, 0, 1, 1], [], []>} : vector<2x128xbf16>, vector<128x512xbf16>, vector<2x512xf32> -> vector<2x512xf32>
    %c3 = arith.constant 3 : index
    %c0_60 = arith.constant 0 : index
    %c0_61 = arith.constant 0 : index
    %184 = vector.load %arg2[%c3, %c0_60, %c0_61] : memref<4x2x512xbf16, #tpu.memory_space<vmem>>, vector<1x2x512xbf16>
    %185 = vector.shape_cast %184 : vector<1x2x512xbf16> to vector<2x512xbf16>
    %186 = arith.extf %185 : vector<2x512xbf16> to vector<2x512xf32>
    %187 = arith.truncf %178 : vector<2x128xf32> to vector<2x128xbf16>
    %cst_62 = arith.constant dense<0.000000e+00> : vector<2x512xf32>
    %188 = tpu.matmul %187, %3, %cst_62 {dimension_numbers = #tpu.dot_dimension_numbers<[1], [0], [0], [1], [0, 0, 1, 1], [], []>} : vector<2x128xbf16>, vector<128x512xbf16>, vector<2x512xf32> -> vector<2x512xf32>
    %189 = arith.addf %186, %188 : vector<2x512xf32>
    %190 = vector.extract_strided_slice %189 {offsets = [0, 0], sizes = [2, 384], strides = [1, 1]} : vector<2x512xf32> to vector<2x384xf32>
    %191 = arith.negf %190 : vector<2x384xf32>
    %192 = math.exp %191 : vector<2x384xf32>
    %cst_63 = arith.constant 1.000000e+00 : f32
    %193 = vector.broadcast %cst_63 : f32 to vector<2x384xf32>
    %194 = arith.addf %193, %192 : vector<2x384xf32>
    %195 = arith.divf %193, %194 : vector<2x384xf32>
    %196 = vector.extract_strided_slice %195 {offsets = [0, 0], sizes = [2, 128], strides = [1, 1]} : vector<2x384xf32> to vector<2x128xf32>
    %197 = vector.extract_strided_slice %195 {offsets = [0, 128], sizes = [2, 128], strides = [1, 1]} : vector<2x384xf32> to vector<2x128xf32>
    %198 = vector.extract_strided_slice %195 {offsets = [0, 256], sizes = [2, 128], strides = [1, 1]} : vector<2x384xf32> to vector<2x128xf32>
    %199 = vector.extract_strided_slice %189 {offsets = [0, 384], sizes = [2, 128], strides = [1, 1]} : vector<2x512xf32> to vector<2x128xf32>
    %200 = math.tanh %199 : vector<2x128xf32>
    %201 = arith.mulf %197, %179 : vector<2x128xf32>
    %202 = arith.mulf %196, %200 : vector<2x128xf32>
    %203 = arith.addf %201, %202 : vector<2x128xf32>
    %204 = math.tanh %203 : vector<2x128xf32>
    %205 = arith.mulf %198, %204 : vector<2x128xf32>
    %206 = arith.addf %183, %8 : vector<2x512xf32>
    %207 = arith.truncf %205 : vector<2x128xf32> to vector<2x128xbf16>
    %cst_64 = arith.constant dense<0.000000e+00> : vector<2x512xf32>
    %208 = tpu.matmul %207, %4, %cst_64 {dimension_numbers = #tpu.dot_dimension_numbers<[1], [0], [0], [1], [0, 0, 1, 1], [], []>} : vector<2x128xbf16>, vector<128x512xbf16>, vector<2x512xf32> -> vector<2x512xf32>
    %209 = arith.addf %206, %208 : vector<2x512xf32>
    %210 = vector.extract_strided_slice %209 {offsets = [0, 0], sizes = [2, 384], strides = [1, 1]} : vector<2x512xf32> to vector<2x384xf32>
    %211 = arith.negf %210 : vector<2x384xf32>
    %212 = math.exp %211 : vector<2x384xf32>
    %cst_65 = arith.constant 1.000000e+00 : f32
    %213 = vector.broadcast %cst_65 : f32 to vector<2x384xf32>
    %214 = arith.addf %213, %212 : vector<2x384xf32>
    %215 = arith.divf %213, %214 : vector<2x384xf32>
    %216 = vector.extract_strided_slice %215 {offsets = [0, 0], sizes = [2, 128], strides = [1, 1]} : vector<2x384xf32> to vector<2x128xf32>
    %217 = vector.extract_strided_slice %215 {offsets = [0, 128], sizes = [2, 128], strides = [1, 1]} : vector<2x384xf32> to vector<2x128xf32>
    %218 = vector.extract_strided_slice %215 {offsets = [0, 256], sizes = [2, 128], strides = [1, 1]} : vector<2x384xf32> to vector<2x128xf32>
    %219 = vector.extract_strided_slice %209 {offsets = [0, 384], sizes = [2, 128], strides = [1, 1]} : vector<2x512xf32> to vector<2x128xf32>
    %220 = math.tanh %219 : vector<2x128xf32>
    %221 = arith.mulf %217, %181 : vector<2x128xf32>
    %222 = arith.mulf %216, %220 : vector<2x128xf32>
    %223 = arith.addf %221, %222 : vector<2x128xf32>
    %224 = math.tanh %223 : vector<2x128xf32>
    %225 = arith.mulf %218, %224 : vector<2x128xf32>
    %c3_66 = arith.constant 3 : index
    %c0_67 = arith.constant 0 : index
    %c0_68 = arith.constant 0 : index
    %226 = vector.load %arg10[%c3_66, %c0_67, %c0_68] : memref<4x2x128xf32, #tpu.memory_space<vmem>>, vector<1x2x128xf32>
    %227 = vector.shape_cast %226 : vector<1x2x128xf32> to vector<2x128xf32>
    %228 = vector.shape_cast %225 : vector<2x128xf32> to vector<1x2x128xf32>
    tpu.vector_store %arg10[%c3_66, %c0_67, %c0_68], %228 {strides = array<i32>} : memref<4x2x128xf32, #tpu.memory_space<vmem>>, vector<1x2x128xf32>,
    %c3_69 = arith.constant 3 : index
    %c0_70 = arith.constant 0 : index
    %c0_71 = arith.constant 0 : index
    %229 = vector.load %arg3[%c3_69, %c0_70, %c0_71] : memref<4x2x1xf32, #tpu.memory_space<vmem>>, vector<1x2x1xf32>
    %230 = vector.shape_cast %229 : vector<1x2x1xf32> to vector<2x1xf32>
    %231 = vector.shape_cast %230 : vector<2x1xf32> to vector<2x1xf32>
    %232 = vector.broadcast %231 : vector<2x1xf32> to vector<2x128xf32>
    %233 = arith.mulf %232, %205 : vector<2x128xf32>
    %234 = arith.mulf %232, %203 : vector<2x128xf32>
    %235 = arith.mulf %232, %225 : vector<2x128xf32>
    %236 = arith.mulf %232, %223 : vector<2x128xf32>
    %c0_72 = arith.constant 0 : index
    %c0_73 = arith.constant 0 : index
    %c0_74 = arith.constant 0 : index
    %237 = vector.load %arg11[%c0_72, %c0_73, %c0_74] : memref<2x2x128xf32, #tpu.memory_space<vmem>>, vector<1x2x128xf32>
    %238 = vector.shape_cast %237 : vector<1x2x128xf32> to vector<2x128xf32>
    %239 = vector.shape_cast %233 : vector<2x128xf32> to vector<1x2x128xf32>
    tpu.vector_store %arg11[%c0_72, %c0_73, %c0_74], %239 {strides = array<i32>} : memref<2x2x128xf32, #tpu.memory_space<vmem>>, vector<1x2x128xf32>,
    %c1_75 = arith.constant 1 : index
    %c0_76 = arith.constant 0 : index
    %c0_77 = arith.constant 0 : index
    %240 = vector.load %arg11[%c1_75, %c0_76, %c0_77] : memref<2x2x128xf32, #tpu.memory_space<vmem>>, vector<1x2x128xf32>
    %241 = vector.shape_cast %240 : vector<1x2x128xf32> to vector<2x128xf32>
    %242 = vector.shape_cast %235 : vector<2x128xf32> to vector<1x2x128xf32>
    tpu.vector_store %arg11[%c1_75, %c0_76, %c0_77], %242 {strides = array<i32>} : memref<2x2x128xf32, #tpu.memory_space<vmem>>, vector<1x2x128xf32>,
    %c0_78 = arith.constant 0 : index
    %c0_79 = arith.constant 0 : index
    %c0_80 = arith.constant 0 : index
    %243 = vector.load %arg12[%c0_78, %c0_79, %c0_80] : memref<2x2x128xf32, #tpu.memory_space<vmem>>, vector<1x2x128xf32>
    %244 = vector.shape_cast %243 : vector<1x2x128xf32> to vector<2x128xf32>
    %245 = vector.shape_cast %234 : vector<2x128xf32> to vector<1x2x128xf32>
    tpu.vector_store %arg12[%c0_78, %c0_79, %c0_80], %245 {strides = array<i32>} : memref<2x2x128xf32, #tpu.memory_space<vmem>>, vector<1x2x128xf32>,
    %c1_81 = arith.constant 1 : index
    %c0_82 = arith.constant 0 : index
    %c0_83 = arith.constant 0 : index
    %246 = vector.load %arg12[%c1_81, %c0_82, %c0_83] : memref<2x2x128xf32, #tpu.memory_space<vmem>>, vector<1x2x128xf32>
    %247 = vector.shape_cast %246 : vector<1x2x128xf32> to vector<2x128xf32>
    %248 = vector.shape_cast %236 : vector<2x128xf32> to vector<1x2x128xf32>
    tpu.vector_store %arg12[%c1_81, %c0_82, %c0_83], %248 {strides = array<i32>} : memref<2x2x128xf32, #tpu.memory_space<vmem>>, vector<1x2x128xf32>,
    return
  }
  func.func @transform_0(%arg0: i32, %arg1: i32) -> (i32, i32, i32) {
    %c0_i32 = arith.constant 0 : i32
    %c0_i32_0 = arith.constant 0 : i32
    return %arg1, %arg0, %c0_i32 : i32, i32, i32
  }
  func.func @transform_1(%arg0: i32, %arg1: i32) -> (i32, i32, i32) {
    %c0_i32 = arith.constant 0 : i32
    %c0_i32_0 = arith.constant 0 : i32
    return %arg1, %arg0, %c0_i32 : i32, i32, i32
  }
  func.func @transform_2(%arg0: i32, %arg1: i32) -> (i32, i32, i32) {
    %c0_i32 = arith.constant 0 : i32
    %c0_i32_0 = arith.constant 0 : i32
    %c0_i32_1 = arith.constant 0 : i32
    return %c0_i32, %arg0, %c0_i32_0 : i32, i32, i32
  }
  func.func @transform_3(%arg0: i32, %arg1: i32) -> (i32, i32, i32) {
    %c0_i32 = arith.constant 0 : i32
    %c0_i32_0 = arith.constant 0 : i32
    %c0_i32_1 = arith.constant 0 : i32
    return %c0_i32, %arg0, %c0_i32_0 : i32, i32, i32
  }
  func.func @transform_4(%arg0: i32, %arg1: i32) -> (i32, i32) {
    %c0_i32 = arith.constant 0 : i32
    %c0_i32_0 = arith.constant 0 : i32
    %c0_i32_1 = arith.constant 0 : i32
    return %c0_i32, %c0_i32_0 : i32, i32
  }
  func.func @transform_5(%arg0: i32, %arg1: i32) -> (i32, i32) {
    %c0_i32 = arith.constant 0 : i32
    %c0_i32_0 = arith.constant 0 : i32
    %c0_i32_1 = arith.constant 0 : i32
    return %c0_i32, %c0_i32_0 : i32, i32
  }
  func.func @transform_6(%arg0: i32, %arg1: i32) -> (i32, i32) {
    %c0_i32 = arith.constant 0 : i32
    %c0_i32_0 = arith.constant 0 : i32
    %c0_i32_1 = arith.constant 0 : i32
    return %c0_i32, %c0_i32_0 : i32, i32
  }
  func.func @transform_7(%arg0: i32, %arg1: i32) -> (i32, i32) {
    %c0_i32 = arith.constant 0 : i32
    %c0_i32_0 = arith.constant 0 : i32
    %c0_i32_1 = arith.constant 0 : i32
    return %c0_i32, %c0_i32_0 : i32, i32
  }
  func.func @transform_8(%arg0: i32, %arg1: i32) -> (i32, i32, i32) {
    %c0_i32 = arith.constant 0 : i32
    %c0_i32_0 = arith.constant 0 : i32
    return %arg1, %arg0, %c0_i32 : i32, i32, i32
  }
  func.func @transform_9(%arg0: i32, %arg1: i32) -> (i32, i32, i32) {
    %c0_i32 = arith.constant 0 : i32
    %c0_i32_0 = arith.constant 0 : i32
    %c0_i32_1 = arith.constant 0 : i32
    return %c0_i32, %arg0, %c0_i32_0 : i32, i32, i32
  }
  func.func @transform_10(%arg0: i32, %arg1: i32) -> (i32, i32, i32) {
    %c0_i32 = arith.constant 0 : i32
    %c0_i32_0 = arith.constant 0 : i32
    %c0_i32_1 = arith.constant 0 : i32
    return %c0_i32, %arg0, %c0_i32_0 : i32, i32, i32
  }
}

</mosaic_0001>

<bundles_post_ra>
// kernel: tpu_custom_call.1
= control target key start
LH: loop header
LB: loop body
LE: loop exit
PB: predicated region body
PF: predicated region fallthrough
CT: control target
= control target key end

     0   :  { %s4592_s0 = inlined_call_operand.vmem [shape: bf16[8,2,512], index: 0, kind: input, shape index: {}]   ;;  %s4593_s1 = inlined_call_operand.vmem [shape: f32[8,2,1], index: 1, kind: input, shape index: {}]   ;;  %s4594_s2 = inlined_call_operand.hbm [shape: f32[2,2,128], index: 2, kind: input, shape index: {}, may-alias: {2,9}]   ;;  %s4595_s3 = inlined_call_operand.hbm [shape: f32[2,2,128], index: 3, kind: input, shape index: {}, may-alias: {3,10}]   ;;  %s4596_s4 = inlined_call_operand.hbm [shape: bf16[128,512], index: 4, kind: input, shape index: {}]   ;;  %s4597_s5 = inlined_call_operand.hbm [shape: bf16[128,512], index: 5, kind: input, shape index: {}]   ;;  %s4598_s6 = inlined_call_operand.hbm [shape: bf16[128,512], index: 6, kind: input, shape index: {}]   ;;  %s4599_s7 = inlined_call_operand.vmem [shape: f32[1,512], index: 7, kind: input, shape index: {}]   ;;  %s4600_s8 = inlined_call_operand.hbm [shape: f32[8,2,128], index: 8, kind: output, shape index: {0}]   ;;  %s4601_s9 = inlined_call_operand.hbm [shape: f32[2,2,128], index: 9, kind: output, shape index: {1}, may-alias: {2,9}]   ;;  %s4602_s10 = inlined_call_operand.hbm [shape: f32[2,2,128], index: 10, kind: output, shape index: {2}, may-alias: {3,10}]  }
   0x1   :  { %4742 = sst [smem:[#allocation78_spill]] %s4595_s3 }
   0x2   :  { %16 = vsyncpa [#allocation3], 0 }
   0x3   :  { %17 = vsyncpa [#allocation6], 0 }
   0x4   :  { %18 = vsyncpa [#allocation9], 0 }
   0x5   :  { %19 = vsyncpa [#allocation4], 0 }
   0x6   :  { %21 = vsyncpa [#allocation4 + $0x1], 0 }
   0x7   :  { %22 = vsyncpa [#allocation13], 0  ;;  %s3655_s13 = smov 0   ;;  %s3657_s14 = smov 0  }
   0x8   :  { %s3659_s15 = smov 0   ;;  %s3661_s16 = smov 0  }
   0x9   :  { %s3663_s17 = smov 0   ;;  %s3665_s18 = smov 0  }
   0xa LB: > { %4743 = sst [smem:[#allocation20_spill]] %s3570_s15  ;;  %s2694_s19 = sadd.s32 4294967295, %s3582_s18   ;;  %s3582_s18 = sphi %s3665_s18, %s28_s18   ;;  %s3578_s17 = sphi %s3663_s17, %s4935_s17   ;;  %s3574_s16 = sphi %s3661_s16, %s4934_s16   ;;  %s3570_s15 = sphi %s3659_s15, %s4933_s15   ;;  %s3566_s14 = sphi %s3657_s14, %s4937_s14   ;;  %s3562_s13 = sphi %s3655_s13, %s4936_s13  }
   0xb   : > { %4744 = sst [smem:[#allocation21_spill]] %s3578_s17  ;;  %s2695_s20 = sadd.s32 4294967294, %s3582_s18  }
   0xc   : > { %s37_s21 = sadd.s32 1, %s3578_s17  ;;  %s241_s22 = sadd.s32 1, %s3570_s15 }
   0xd   : > { %p38_p0 = scmp.ge.s32.totalorder %s37_s21, 2  ;;  %p251_p1 = scmp.ne.s32.totalorder %s3570_s15, %s3566_s14 }
   0xe   : > { %p3691_p2 = scmp.eq.s32.totalorder %s2694_s19, 1  ;;  %p257_p3 = scmp.ne.s32.totalorder %s3566_s14, %s3562_s13 }
   0xf   : > { %s4939_s21 = smov (%p38_p0, %s37_s21), 0  ;;  %p258_p5 = scmp.eq.s32.totalorder %s2695_s20, 1 }
  0x10   : > { %s4745_s23 = scalar_select %p3691_p2, 1, 0 }
  0x11   : > { %4746 = sst [smem:[#allocation22_spill]] %s4939_s21  ;;  %p3701_p4 = por %p3691_p2, %p251_p1 }
  0x12   : > { %s236_s25 = ssub.s32 %s3578_s17, %s4939_s21  ;;  %p2696_p6 = scmp.ge.s32.totalorder %s3582_s18, 1 }
  0x13   : > { %p239_p7 = scmp.eq.s32.totalorder %s236_s25, 0  ;;  %p3708_p8 = por %p258_p5, %p257_p3 }
  0x14   : > { %p317_p9 = scmp.lt.s32.totalorder %s3582_s18, 3  ;;  %p3720_p11 = scmp.eq.s32.totalorder %s2694_s19, 0 }
  0x15   : > { %s4748_s26 = scalar_select %p3708_p8, 1, 0 }
  0x16   : > { %s3714_s27 = scalar_select %p239_p7, %s3570_s15, %s241_s22  }
  0x17   : > { %4749 = sst [smem:[#allocation23_spill]] %s4748_s26  ;;  %p3716_p10 = pnand %p2696_p6, %p317_p9 }
  0x18   : > { %4750 = sst [smem:[#allocation24_spill]] %s3714_s27  ;;  %s3584_s30 = smov [#allocation5]  }
  0x19   : > { %p2876_p12 = pneg %p3716_p10  ;;  %s346_s11 = sshll.u32 %s3584_s30, 4  ;;  %s347_s11 = int_to_ptr.vmem [resolvable:$true] %s346_s11 }
  0x1a   : > { %s3585_s20 = smov [#allocation8]   ;;  %s3323_s25 = scalar_lea.vmem %s347_s11, 64 }
  0x1b   : > { %p3728_p13 = pnand %p3720_p11, %p2876_p12  ;;  %s372_s22 = sshll.u32 %s3585_s20, 4  ;;  %s373_s22 = int_to_ptr.vmem [resolvable:$true] %s372_s22 }
  0x1c   : > { %p3324_p1 = scmp.ne.s32.totalorder %s347_s11, %s3323_s25  ;;  %p3331_p6 = scmp.lt.s32.totalorder %s347_s11, %s347_s11 }
  0x1d   : > { %p3734_p0 = pneg %p3728_p13  ;;  %p3332_p7 = scmp.lt.s32.totalorder %s3323_s25, %s3323_s25 }
  0x1f   : > { %p3326_p3 = pnand %p3324_p1, %p3734_p0  ;;  %p3333_p9 = por %p3332_p7, %p3331_p6 }
  0x21   : > { %p3327_p5 = pneg %p3326_p3 }
  0x23   : > { %p3334_p12 = pnand %p3333_p9, %p3327_p5 }
  0x25   : > { %3337 = shalt.err (!%p3334_p12)
}
  0x26   : > { %s4606_s30 = smov 32   ;;  %s4607_s20 = smov 2  }
  0x27   : > { %s4755_s3 = sld [smem:[#allocation78_spill]]  ;;  %s3349_s27 = scalar_lea.vmem %s373_s22, 4096 }
  0x28   : > { %p3350_p1 = scmp.ne.s32.totalorder %s373_s22, %s3349_s27  ;;  %p3357_p5 = scmp.lt.s32.totalorder %s373_s22, %s373_s22 }
  0x29   : > { %p3358_p7 = scmp.lt.s32.totalorder %s3349_s27, %s3349_s27 }
  0x2a   : > { %p3352_p3 = pnand %p3350_p1, %p3734_p0 }
  0x2b   : > { %p3359_p9 = por %p3358_p7, %p3357_p5 }
  0x2c   : > { %p3353_p6 = pneg %p3352_p3 }
  0x2d   : > { %2882 = dma.hbm_to_vmem [thread:$0]  (!%p3728_p13), %s4755_s3, 64, %s347_s11, [#allocation6], %s4606_s30, %s4606_s30, %s4607_s20  }
  0x2e   : > { %p3360_p12 = pnand %p3359_p9, %p3353_p6 }
  0x30   : > { %3363 = shalt.err (!%p3360_p12)
}
  0x31   : > { %s3588_s25 = smov 256   ;;  %s3589_s15 = smov 16  }
  0x32   : > { %2888 = dma.hbm_to_vmem [thread:$0]  (!%p3728_p13), %s4597_s5, 4096, %s373_s22, [#allocation9], %s3588_s25, %s3588_s25, %s3589_s15  }
  0x33   : > { %s3590_s11 = smov [#allocation2]   ;;  %s3591_s20 = smov [#allocation7]  }
  0x34   : > { %s331_s30 = sshll.u32 %s3590_s11, 4  ;;  %s359_s27 = sshll.u32 %s3591_s20, 4  ;;  %s332_s30 = int_to_ptr.vmem [resolvable:$true] %s331_s30  ;;  %s360_s27 = int_to_ptr.vmem [resolvable:$true] %s359_s27 }
  0x35   : > { %s3375_s3 = scalar_lea.vmem %s332_s30, 64  ;;  %p3383_p5 = scmp.lt.s32.totalorder %s332_s30, %s332_s30 }
  0x36   : > { %p3376_p1 = scmp.ne.s32.totalorder %s332_s30, %s3375_s3  ;;  %p3384_p7 = scmp.lt.s32.totalorder %s3375_s3, %s3375_s3 }
  0x38   : > { %p3378_p3 = pnand %p3376_p1, %p3734_p0  ;;  %p3385_p9 = por %p3384_p7, %p3383_p5 }
  0x3a   : > { %p3379_p6 = pneg %p3378_p3 }
  0x3c   : > { %p3386_p12 = pnand %p3385_p9, %p3379_p6 }
  0x3e   : > { %3389 = shalt.err (!%p3386_p12)
}
  0x3f   : > { %s4756_s26 = smov 2   ;;  %s4757_s17 = smov 32  }
  0x40   : > { %2879 = dma.hbm_to_vmem [thread:$0]  (!%p3728_p13), %s4594_s2, 64, %s332_s30, [#allocation3], %s4757_s17, %s4757_s17, %s4756_s26  }
  0x41   : > { %s3401_s20 = scalar_lea.vmem %s360_s27, 4096  ;;  %p3409_p2 = scmp.lt.s32.totalorder %s360_s27, %s360_s27 }
  0x42   : > { %p3402_p8 = scmp.ne.s32.totalorder %s360_s27, %s3401_s20  ;;  %p3410_p5 = scmp.lt.s32.totalorder %s3401_s20, %s3401_s20 }
  0x44   : > { %p3404_p1 = pnand %p3402_p8, %p3734_p0  ;;  %p3411_p6 = por %p3410_p5, %p3409_p2 }
  0x46   : > { %p3405_p3 = pneg %p3404_p1 }
  0x48   : > { %p3412_p7 = pnand %p3411_p6, %p3405_p3 }
  0x4a   : > { %3415 = shalt.err (!%p3412_p7)
}
  0x4b   : > { %2885 = dma.hbm_to_vmem [thread:$0]  (!%p3728_p13), %s4596_s4, 4096, %s360_s27, [#allocation6], %s3588_s25, %s3588_s25, %s3589_s15  }
  0x4c   : > { %s3592_s26 = smov [#allocation10]  }
  0x4d   : > { %s385_s30 = sshll.u32 %s3592_s26, 4  ;;  %s386_s30 = int_to_ptr.vmem [resolvable:$true] %s385_s30 }
  0x4e   : > { %s3427_s17 = scalar_lea.vmem %s386_s30, 4096  ;;  %p3435_p12 = scmp.lt.s32.totalorder %s386_s30, %s386_s30 }
  0x4f   : > { %p3428_p8 = scmp.ne.s32.totalorder %s386_s30, %s3427_s17  ;;  %p3436_p1 = scmp.lt.s32.totalorder %s3427_s17, %s3427_s17 }
  0x51   : > { %p3430_p9 = pnand %p3428_p8, %p3734_p0  ;;  %p3437_p3 = por %p3436_p1, %p3435_p12 }
  0x53   : > { %p3431_p2 = pneg %p3430_p9 }
  0x55   : > { %p3438_p5 = pnand %p3437_p3, %p3431_p2 }
  0x57   : > { %3441 = shalt.err (!%p3438_p5)
}
  0x58   : > { %2891 = dma.hbm_to_vmem [thread:$0]  (!%p3728_p13), %s4598_s6, 4096, %s386_s30, [#allocation9], %s3588_s25, %s3588_s25, %s3589_s15  }
  0x59   : > { %429 = sbr.rel (%p3716_p10) target bundleno = 1569 (0x621), region = 52 }
  0x5e   : > { %3541 = dma.done.wait (%p3720_p11), [#allocation3], 64  }
  0x5f   : > { %3543 = vsyncadd (%p3720_p11), [#allocation3], 4294967232 }
  0x60   : > { %3545 = dma.done.wait (%p3720_p11), [#allocation6], 4160  }
  0x61   : > { %3547 = vsyncadd (%p3720_p11), [#allocation6], 4294963136 }
  0x62   : > { %3549 = dma.done.wait (%p3720_p11), [#allocation9], 8192  }
  0x63   : > { %3551 = vsyncadd (%p3720_p11), [#allocation9], 4294959104  ;;  %s488_s15 = sand.u32 1, %s3566_s14   ;;  %s2710_s28 = sshll.u32 %s3574_s16, 2 }
  0x64   : > { %s2709_s12 = sshll.u32 %s488_s15, 3  ;;  %p496_p10 = scmp.lt.s32.totalorder %s2710_s28, 7 }
  0x65   : > { %s3816_s30 = scalar_lea.vmem [#allocation11], %s2709_s12  ;;  %p2714_p11 = scmp.ne.s32.totalorder %s3574_s16, 0 }
  0x66   : > { %s4941_s28 = smov (!%p496_p10, %s2710_s28), 7 }
  0x67   : > { %s2711_s19 = sshll.u32 %s4941_s28, 2  ;;  %s2713_s25 = sshll.u32 %s4941_s28, 1 }
  0x68   : > { %s3809_s3 = scalar_lea.vmem %s4592_s0, %s2711_s19  ;;  %s3814_s29 = scalar_lea.vmem %s4593_s1, %s2713_s25 }
  0x69   : > { %519 = sbr.rel (%p2714_p11) target bundleno = 112 (0x70), region = 76 }
  0x6e   : > { %v520_v0 = vld [vmem:[#allocation2] sm:$0xf]   ;;  %v524_v1 = vld [vmem:[#allocation5] sm:$0xf]  }
  0x6f   : > { %522 = vst [vmem:[#allocation12] sm:$0xf] %v520_v0   ;;  %526 = vst [vmem:[#allocation14] sm:$0xf] %v524_v1  }
  0x70 PF: > { %v3819_v2 = vld [vmem:[#allocation7 + $0xe4] ss:$16 sps:$4 sm:$0xff]   ;;  %v3821_v3 = vld [vmem:[#allocation7 + $0xec] ss:$16 sps:$4 sm:$0xff]   ;;  %v4611_v4 = vmov 0   ;;  %s2845_s27 = sshll.u32 %s3574_s16, 7 }
  0x71   : > { %848 = vmatprep.mubr.bf16.mxu0 %v4611_v4  ;;  %889 = vmatprep.mubr.bf16.mxu1 %v4611_v4  ;;  %v3826_v5 = vld [vmem:[#allocation7 + $0xe0] ss:$16 sps:$4 sm:$0xff]   ;;  %v3828_v6 = vld [vmem:[#allocation7 + $0xe8] ss:$16 sps:$4 sm:$0xff]   ;;  %v3832_v7 = vld [vmem:[#allocation7 + $0xc4] ss:$16 sps:$4 sm:$0xff]   ;;  %s4507_s11 = scalar_lea.hbm %s4600_s8, %s2845_s27 }
  0x72   : > { %816 = vmatprep.subr.bf16.mxu0 %v3819_v2  ;;  %2974 = vset.pattern.permute.xlu0 %v4611_v4  ;;  %v3837_v8 = vld [vmem:[#allocation7 + $0xcc] ss:$16 sps:$4 sm:$0xff]   ;;  %v3839_v9 = vld [vmem:[#allocation7 + $0xc0] ss:$16 sps:$4 sm:$0xff]   ;;  %v3842_v10 = vld [vmem:[#allocation7 + $0xc8] ss:$16 sps:$4 sm:$0xff]  }
  0x73   : > { %857 = vmatprep.subr.bf16.mxu1 %v3821_v3  ;;  %2975 = vset.pattern.permute.xlu1 %v4611_v4  ;;  %v3845_v11 = vld [vmem:[#allocation7 + $0xa4] ss:$16 sps:$4 sm:$0xff]   ;;  %v3847_v12 = vld [vmem:[#allocation7 + $0xac] ss:$16 sps:$4 sm:$0xff]   ;;  %v3849_v13 = vld [vmem:[#allocation7 + $0xa0] ss:$16 sps:$4 sm:$0xff]  }
  0x74   : > { %817 = vmatpush1.bf16.msra.mxu0 %v3826_v5  ;;  %858 = vmatpush1.bf16.msra.mxu1 %v3828_v6  ;;  %v3851_v14 = vld [vmem:[#allocation7 + $0xa8] ss:$16 sps:$4 sm:$0xff]   ;;  %v3855_v15 = vld [vmem:[#allocation7 + $0x84] ss:$16 sps:$4 sm:$0xff]   ;;  %v3859_v16 = vld [vmem:[#allocation7 + $0x8c] ss:$16 sps:$4 sm:$0xff]  }
  0x75   : > { %818 = vmatprep.subr.bf16.mxu0 %v3832_v7  ;;  %859 = vmatprep.subr.bf16.mxu1 %v3837_v8  ;;  %v3861_v17 = vld [vmem:[#allocation7 + $0x80] ss:$16 sps:$4 sm:$0xff]   ;;  %v3865_v18 = vld [vmem:[#allocation7 + $0x88] ss:$16 sps:$4 sm:$0xff]   ;;  %v3867_v19 = vld [vmem:[#allocation7 + $0x64] ss:$16 sps:$4 sm:$0xff]  }
  0x76   : > { %v3871_v20 = vld [vmem:[#allocation7 + $0x6c] ss:$16 sps:$4 sm:$0xff]   ;;  %v3873_v21 = vld [vmem:[#allocation7 + $0x60] ss:$16 sps:$4 sm:$0xff]   ;;  %v3875_v22 = vld [vmem:[#allocation7 + $0x68] ss:$16 sps:$4 sm:$0xff]  }
  0x77   : > { %v3879_v23 = vld [vmem:[#allocation7 + $0x44] ss:$16 sps:$4 sm:$0xff]   ;;  %v3883_v24 = vld [vmem:[#allocation7 + $0x4c] ss:$16 sps:$4 sm:$0xff]   ;;  %v3887_v25 = vld [vmem:[#allocation7 + $0x40] ss:$16 sps:$4 sm:$0xff]  }
  0x78   : > { %819 = vmatpush1.bf16.msra.mxu0 %v3839_v9  ;;  %860 = vmatpush1.bf16.msra.mxu1 %v3842_v10  ;;  %v3889_v26 = vld [vmem:[#allocation7 + $0x48] ss:$16 sps:$4 sm:$0xff]   ;;  %v3893_v27 = vld [vmem:[#allocation7 + $0x24] ss:$16 sps:$4 sm:$0xff]   ;;  %v3895_v28 = vld [vmem:[#allocation7 + $0x2c] ss:$16 sps:$4 sm:$0xff]  }
  0x79   : > { %820 = vmatprep.subr.bf16.mxu0 %v3845_v11  ;;  %861 = vmatprep.subr.bf16.mxu1 %v3847_v12  ;;  %v1455_v29 = vld [vmem:[%s3814_s29] sm:$0x3]  ;;  %v3898_v30 = vld [vmem:[#allocation7 + $0x20] ss:$16 sps:$4 sm:$0xff]   ;;  %v2821_v31 = vld [vmem:[%s3814_s29 + $0x2] sm:$0x3] }
  0x7a   : > { %1458 = vperm.xlu0 %2974, %v1455_v29   ;;  %v3903_v32 = vld [vmem:[#allocation7 + $0x28] ss:$16 sps:$4 sm:$0xff]   ;;  %v3905_v33 = vld [vmem:[#allocation7 + $0x4] ss:$16 sps:$4 sm:$0xff]   ;;  %v3907_v34 = vld [vmem:[#allocation7 + $0xc] ss:$16 sps:$4 sm:$0xff]  }
  0x7b   : > { %v3911_v35 = vld [vmem:[#allocation7] ss:$16 sps:$4 sm:$0xff]   ;;  %v3913_v36 = vld [vmem:[#allocation7 + $0x8] ss:$16 sps:$4 sm:$0xff]   ;;  %v3915_v38 = vld [vmem:[#allocation10 + $0xe4] ss:$16 sps:$4 sm:$0xff]  }
  0x7c   : > { %821 = vmatpush1.bf16.msra.mxu0 %v3849_v13  ;;  %862 = vmatpush1.bf16.msra.mxu1 %v3851_v14  ;;  %v646_v37 = vld [vmem:[#allocation12] sm:$0x3]  ;;  %v3917_v39 = vld [vmem:[#allocation10 + $0xec] ss:$16 sps:$4 sm:$0xff]   ;;  %v3925_v41 = vld [vmem:[#allocation10 + $0xe8] ss:$16 sps:$4 sm:$0xff]  }
  0x7d   : > { %822 = vmatprep.subr.bf16.mxu0 %v3855_v15  ;;  %863 = vmatprep.subr.bf16.mxu1 %v3859_v16  ;;  %v3923_v40 = vld [vmem:[#allocation10 + $0xe0] ss:$16 sps:$4 sm:$0xff]   ;;  %v655_v42 = vpack.c.bf16 %v646_v37, %v646_v37  ;;  %v3935_v43 = vld [vmem:[#allocation10 + $0xc4] ss:$16 sps:$4 sm:$0xff]   ;;  %v3937_v44 = vld [vmem:[#allocation10 + $0xcc] ss:$16 sps:$4 sm:$0xff]  }
  0x7e   : > { %1794 = vperm.xlu0 %2974, %v2821_v31   ;;  %v3941_v45 = vld [vmem:[#allocation10 + $0xc0] ss:$16 sps:$4 sm:$0xff]   ;;  %v3943_v46 = vld [vmem:[#allocation10 + $0xc8] ss:$16 sps:$4 sm:$0xff]   ;;  %v3947_v47 = vld [vmem:[#allocation10 + $0xa4] ss:$16 sps:$4 sm:$0xff]  }
  0x7f   : > { %v3949_v48 = vld [vmem:[#allocation10 + $0xac] ss:$16 sps:$4 sm:$0xff]   ;;  %v3951_v49 = vld [vmem:[#allocation10 + $0xa0] ss:$16 sps:$4 sm:$0xff]   ;;  %v3953_v50 = vld [vmem:[#allocation10 + $0xa8] ss:$16 sps:$4 sm:$0xff]  }
  0x80   : > { %823 = vmatpush1.bf16.msra.mxu0 %v3861_v17  ;;  %864 = vmatpush1.bf16.msra.mxu1 %v3865_v18  ;;  %v3959_v51 = vld [vmem:[#allocation10 + $0x84] ss:$16 sps:$4 sm:$0xff]   ;;  %v3961_v52 = vld [vmem:[#allocation10 + $0x8c] ss:$16 sps:$4 sm:$0xff]   ;;  %v3963_v53 = vld [vmem:[#allocation10 + $0x80] ss:$16 sps:$4 sm:$0xff]  }
  0x81   : > { %824 = vmatprep.subr.bf16.mxu0 %v3867_v19  ;;  %865 = vmatprep.subr.bf16.mxu1 %v3871_v20  ;;  %4758 = vst [vmem:[#allocation25_spill] sm:$0xff] %v3959_v51  ;;  %4759 = vst [vmem:[#allocation26_spill] sm:$0xff] %v3961_v52  ;;  %v3965_v54 = vld [vmem:[#allocation10 + $0x88] ss:$16 sps:$4 sm:$0xff]   ;;  %v3971_v55 = vld [vmem:[#allocation10 + $0x64] ss:$16 sps:$4 sm:$0xff]  }
  0x82   : > { %4760 = vst [vmem:[#allocation27_spill] sm:$0xff] %v3963_v53  ;;  %4761 = vst [vmem:[#allocation28_spill] sm:$0xff] %v3965_v54  ;;  %v3973_v56 = vld [vmem:[#allocation10 + $0x6c] ss:$16 sps:$4 sm:$0xff]   ;;  %v3975_v57 = vld [vmem:[#allocation10 + $0x60] ss:$16 sps:$4 sm:$0xff]  }
  0x83   : > { %4762 = vst [vmem:[#allocation29_spill] sm:$0xff] %v3971_v55  ;;  %4763 = vst [vmem:[#allocation30_spill] sm:$0xff] %v3973_v56  ;;  %v3977_v58 = vld [vmem:[#allocation10 + $0x68] ss:$16 sps:$4 sm:$0xff]   ;;  %v3983_v59 = vld [vmem:[#allocation10 + $0x44] ss:$16 sps:$4 sm:$0xff]  }
  0x84   : > { %825 = vmatpush1.bf16.msra.mxu0 %v3873_v21  ;;  %866 = vmatpush1.bf16.msra.mxu1 %v3875_v22  ;;  %4764 = vst [vmem:[#allocation31_spill] sm:$0xff] %v3975_v57  ;;  %4765 = vst [vmem:[#allocation32_spill] sm:$0xff] %v3977_v58  ;;  %v3985_v60 = vld [vmem:[#allocation10 + $0x4c] ss:$16 sps:$4 sm:$0xff]   ;;  %v3987_v61 = vld [vmem:[#allocation10 + $0x40] ss:$16 sps:$4 sm:$0xff]  }
  0x85   : > { %826 = vmatprep.subr.bf16.mxu0 %v3879_v23  ;;  %867 = vmatprep.subr.bf16.mxu1 %v3883_v24  ;;  %4766 = vst [vmem:[#allocation33_spill] sm:$0xff] %v3983_v59  ;;  %4767 = vst [vmem:[#allocation34_spill] sm:$0xff] %v3985_v60  ;;  %v3989_v62 = vld [vmem:[#allocation10 + $0x48] ss:$16 sps:$4 sm:$0xff]   ;;  %v3995_v63 = vld [vmem:[#allocation10 + $0x24] ss:$16 sps:$4 sm:$0xff]  }
  0x86   : > { %4768 = vst [vmem:[#allocation35_spill] sm:$0xff] %v3987_v61  ;;  %4769 = vst [vmem:[#allocation36_spill] sm:$0xff] %v3989_v62  ;;  %v3997_v0 = vld [vmem:[#allocation10 + $0x2c] ss:$16 sps:$4 sm:$0xff]   ;;  %v3999_v1 = vld [vmem:[#allocation10 + $0x20] ss:$16 sps:$4 sm:$0xff]  }
  0x87   : > { %4770 = vst [vmem:[#allocation37_spill] sm:$0xff] %v3995_v63  ;;  %4771 = vst [vmem:[#allocation38_spill] sm:$0xff] %v3997_v0  ;;  %v4001_v29 = vld [vmem:[#allocation10 + $0x28] ss:$16 sps:$4 sm:$0xff]   ;;  %v4007_v31 = vld [vmem:[#allocation10 + $0x4] ss:$16 sps:$4 sm:$0xff]  }
  0x88   : > { %827 = vmatpush1.bf16.msra.mxu0 %v3887_v25  ;;  %868 = vmatpush1.bf16.msra.mxu1 %v3889_v26  ;;  %4772 = vst [vmem:[#allocation39_spill] sm:$0xff] %v3999_v1  ;;  %4773 = vst [vmem:[#allocation40_spill] sm:$0xff] %v4001_v29  ;;  %v4009_v37 = vld [vmem:[#allocation10 + $0xc] ss:$16 sps:$4 sm:$0xff]   ;;  %s2492_s28 = sshll.u32 %s3816_s30, 4  ;;  %s3595_s12 = smov [#allocation12]   ;;  %s4509_s28 = int_to_ptr.vmem [resolvable:$true] %s2492_s28 }
  0x89   : > { %828 = vmatprep.subr.bf16.mxu0 %v3893_v27  ;;  %869 = vmatprep.subr.bf16.mxu1 %v3895_v28  ;;  %4774 = vst [vmem:[#allocation41_spill] sm:$0xff] %v4007_v31  ;;  %4775 = vst [vmem:[#allocation42_spill] sm:$0xff] %v4009_v37  ;;  %s2507_s19 = sshll.u32 %s3595_s12, 4  ;;  %s3596_s25 = smov [#allocation14]   ;;  %s4513_s19 = int_to_ptr.vmem [resolvable:$true] %s2507_s19 }
  0x8a   : > { %s2522_s21 = sshll.u32 %s3596_s25, 4  ;;  %s4519_s16 = scalar_lea.sflag [#allocation4], %s488_s15  ;;  %s4515_s21 = int_to_ptr.vmem [resolvable:$true] %s2522_s21 }
  0x8b   : > { %s3442_s26 = scalar_lea.vmem %s4509_s28, 128 }
  0x8c   : > { %829 = vmatpush1.bf16.msra.mxu0 %v3898_v30  ;;  %870 = vmatpush1.bf16.msra.mxu1 %v3903_v32  ;;  %p3443_p13 = scmp.ne.s32.totalorder %s4509_s28, %s3442_s26 }
  0x8d   : > { %830 = vmatprep.subr.bf16.mxu0 %v3905_v33  ;;  %871 = vmatprep.subr.bf16.mxu1 %v3907_v34 }
  0x8e   : > { %p3444_p0 = pnand %p3443_p13, %p3701_p4 }
  0x90   : > { %831 = vmatpush1.bf16.msra.mxu0 %v3911_v35  ;;  %872 = vmatpush1.bf16.msra.mxu1 %v3913_v36  ;;  %p3445_p6 = pneg %p3444_p0 }
  0x91   : > { %1101 = vmatprep.subr.bf16.mxu0 %v3915_v38  ;;  %1142 = vmatprep.subr.bf16.mxu1 %v3917_v39 }
  0x93   : > { %849 = vmatmul.mubr.bf16.vlgmr.msra.gmra.mxu0 %v655_v42  ;;  %890 = vmatmul.mubr.bf16.vlgmr.msra.gmra.mxu1 %v655_v42  ;;  %v4011_v42 = vld [vmem:[#allocation10] ss:$16 sps:$4 sm:$0xff]  }
  0x94   : > { %1102 = vmatpush1.bf16.msra.mxu0 %v3923_v40  ;;  %1143 = vmatpush1.bf16.msra.mxu1 %v3925_v41  ;;  %4776 = vst [vmem:[#allocation43_spill] sm:$0xff] %v4011_v42 }
  0x95   : > { %1133 = vmatprep.mubr.bf16.mxu0 %v4611_v4  ;;  %1174 = vmatprep.mubr.bf16.mxu1 %v4611_v4  ;;  %v4013_v4 = vld [vmem:[#allocation10 + $0x8] ss:$16 sps:$4 sm:$0xff]  }
  0x96   : > { %1103 = vmatprep.subr.bf16.mxu0 %v3935_v43  ;;  %1144 = vmatprep.subr.bf16.mxu1 %v3937_v44  ;;  %4777 = vst [vmem:[#allocation44_spill] sm:$0xff] %v4013_v4 }
  0x98   : > { %1104 = vmatpush1.bf16.msra.mxu0 %v3941_v45  ;;  %1145 = vmatpush1.bf16.msra.mxu1 %v3943_v46 }
  0x99   : > { %1105 = vmatprep.subr.bf16.mxu0 %v3947_v47  ;;  %1146 = vmatprep.subr.bf16.mxu1 %v3949_v48 }
  0x9c   : > { %1106 = vmatpush1.bf16.msra.mxu0 %v3951_v49  ;;  %1147 = vmatpush1.bf16.msra.mxu1 %v3953_v50 }
  0x9d   : > { %1107 = vmatprep.subr.bf16.mxu0 %v3959_v51  ;;  %1148 = vmatprep.subr.bf16.mxu1 %v3961_v52 }
  0xa0   : > { %1108 = vmatpush1.bf16.msra.mxu0 %v3963_v53  ;;  %1149 = vmatpush1.bf16.msra.mxu1 %v3965_v54 }
  0xa1   : > { %1109 = vmatprep.subr.bf16.mxu0 %v3971_v55  ;;  %1150 = vmatprep.subr.bf16.mxu1 %v3973_v56 }
  0xa4   : > { %1110 = vmatpush1.bf16.msra.mxu0 %v3975_v57  ;;  %1151 = vmatpush1.bf16.msra.mxu1 %v3977_v58  ;;  %v653_v58 = vld [vmem:[%s3809_s3] sm:$0xf] }
  0xa5   : > { %1111 = vmatprep.subr.bf16.mxu0 %v3983_v59  ;;  %1152 = vmatprep.subr.bf16.mxu1 %v3985_v60  ;;  %v4027_v60 = vld [vmem:[#allocation8 + $0xc4] ss:$16 sps:$4 sm:$0xff]   ;;  %v654_v55 = vunpack.c.l.bf16 %v653_v58 }
  0xa6   : > { %4782 = vst [vmem:[#allocation49_spill] sm:$0xff] %v4027_v60 }
  0xa8   : > { %1112 = vmatpush1.bf16.msra.mxu0 %v3987_v61  ;;  %1153 = vmatpush1.bf16.msra.mxu1 %v3989_v62  ;;  %v4023_v62 = vld [vmem:[#allocation8 + $0xe0] ss:$16 sps:$4 sm:$0xff]   ;;  %v4025_v61 = vld [vmem:[#allocation8 + $0xe8] ss:$16 sps:$4 sm:$0xff]  }
  0xa9   : > { %1113 = vmatprep.subr.bf16.mxu0 %v3995_v63  ;;  %1154 = vmatprep.subr.bf16.mxu1 %v3997_v0  ;;  %v649_v0 = vld [vmem:[#allocation12 + $0x2] sm:$0x3]  ;;  %v4019_v63 = vld [vmem:[#allocation8 + $0xe4] ss:$16 sps:$4 sm:$0xff]   ;;  %4780 = vst [vmem:[#allocation47_spill] sm:$0xff] %v4023_v62  ;;  %4781 = vst [vmem:[#allocation48_spill] sm:$0xff] %v4025_v61 }
  0xaa   : > { %4778 = vst [vmem:[#allocation45_spill] sm:$0xff] %v4019_v63 }
  0xac   : > { %1114 = vmatpush1.bf16.msra.mxu0 %v3999_v1  ;;  %1155 = vmatpush1.bf16.msra.mxu1 %v4001_v29  ;;  %v652_v1 = vpack.c.bf16 %v649_v0, %v649_v0  ;;  %v4021_v29 = vld [vmem:[#allocation8 + $0xec] ss:$16 sps:$4 sm:$0xff]   ;;  %v4035_v0 = vld [vmem:[#allocation8 + $0xc0] ss:$16 sps:$4 sm:$0xff]  }
  0xad   : > { %1115 = vmatprep.subr.bf16.mxu0 %v4007_v31  ;;  %1156 = vmatprep.subr.bf16.mxu1 %v4009_v37  ;;  %4779 = vst [vmem:[#allocation46_spill] sm:$0xff] %v4021_v29  ;;  %v4029_v31 = vld [vmem:[#allocation8 + $0xcc] ss:$16 sps:$4 sm:$0xff]   ;;  %4784 = vst [vmem:[#allocation51_spill] sm:$0xff] %v4035_v0  ;;  %v4788_v37 = vmov 0  }
  0xae   : > { %4783 = vst [vmem:[#allocation50_spill] sm:$0xff] %v4029_v31 }
  0xb0   : > { %1116 = vmatpush1.bf16.msra.mxu0 %v4011_v42  ;;  %1157 = vmatpush1.bf16.msra.mxu1 %v4013_v4  ;;  %v4037_v4 = vld [vmem:[#allocation8 + $0xc8] ss:$16 sps:$4 sm:$0xff]   ;;  %v4043_v42 = vld [vmem:[#allocation8 + $0xac] ss:$16 sps:$4 sm:$0xff]  }
  0xb1   : > { %1344 = vmatprep.subr.bf16.mxu0 %v4019_v63  ;;  %1385 = vmatprep.subr.bf16.mxu1 %v4021_v29  ;;  %4785 = vst [vmem:[#allocation52_spill] sm:$0xff] %v4037_v4  ;;  %4787 = vst [vmem:[#allocation54_spill] sm:$0xff] %v4043_v42  ;;  %v4061_v29 = vld [vmem:[#allocation8 + $0x80] ss:$16 sps:$4 sm:$0xff]  }
  0xb2   : > { %4793 = vst [vmem:[#allocation59_spill] sm:$0xff] %v4061_v29 }
  0xb3   : > { %1134 = vmatmul.mubr.bf16.vlgmr.msra.gmra.mxu0 %v652_v1  ;;  %1175 = vmatmul.mubr.bf16.vlgmr.msra.gmra.mxu1 %v652_v1  ;;  %v4041_v1 = vld [vmem:[#allocation8 + $0xa4] ss:$16 sps:$4 sm:$0xff]  }
  0xb4   : > { %1345 = vmatpush1.bf16.msra.mxu0 %v4023_v62  ;;  %1386 = vmatpush1.bf16.msra.mxu1 %v4025_v61  ;;  %4786 = vst [vmem:[#allocation53_spill] sm:$0xff] %v4041_v1  ;;  %v4049_v61 = vld [vmem:[#allocation8 + $0xa0] ss:$16 sps:$4 sm:$0xff]   ;;  %v4051_v62 = vld [vmem:[#allocation8 + $0xa8] ss:$16 sps:$4 sm:$0xff]  }
  0xb5   : > { %1346 = vmatprep.subr.bf16.mxu0 %v4027_v60  ;;  %1387 = vmatprep.subr.bf16.mxu1 %v4029_v31  ;;  %4789 = vst [vmem:[#allocation55_spill] sm:$0xff] %v4049_v61  ;;  %4790 = vst [vmem:[#allocation56_spill] sm:$0xff] %v4051_v62  ;;  %v4055_v31 = vld [vmem:[#allocation8 + $0x84] ss:$16 sps:$4 sm:$0xff]   ;;  %v4057_v60 = vld [vmem:[#allocation8 + $0x8c] ss:$16 sps:$4 sm:$0xff]  }
  0xb6   : > { %1376 = vmatprep.mubr.bf16.mxu0 %v4788_v37  ;;  %1417 = vmatprep.mubr.bf16.mxu1 %v4788_v37  ;;  %4791 = vst [vmem:[#allocation57_spill] sm:$0xff] %v4055_v31  ;;  %4792 = vst [vmem:[#allocation58_spill] sm:$0xff] %v4057_v60 }
  0xb8   : > { %1347 = vmatpush1.bf16.msra.mxu0 %v4035_v0  ;;  %1388 = vmatpush1.bf16.msra.mxu1 %v4037_v4  ;;  %v4063_v0 = vld [vmem:[#allocation8 + $0x88] ss:$16 sps:$4 sm:$0xff]   ;;  %v4073_v4 = vld [vmem:[#allocation8 + $0x60] ss:$16 sps:$4 sm:$0xff]  }
  0xb9   : > { %1348 = vmatprep.subr.bf16.mxu0 %v4041_v1  ;;  %1389 = vmatprep.subr.bf16.mxu1 %v4043_v42  ;;  %4794 = vst [vmem:[#allocation60_spill] sm:$0xff] %v4063_v0  ;;  %v4069_v42 = vld [vmem:[#allocation8 + $0x64] ss:$16 sps:$4 sm:$0xff]   ;;  %v4071_v1 = vld [vmem:[#allocation8 + $0x6c] ss:$16 sps:$4 sm:$0xff]   ;;  %4797 = vst [vmem:[#allocation63_spill] sm:$0xff] %v4073_v4 }
  0xba   : > { %4795 = vst [vmem:[#allocation61_spill] sm:$0xff] %v4069_v42  ;;  %4796 = vst [vmem:[#allocation62_spill] sm:$0xff] %v4071_v1 }
  0xbc   : > { %1349 = vmatpush1.bf16.msra.mxu0 %v4049_v61  ;;  %1390 = vmatpush1.bf16.msra.mxu1 %v4051_v62  ;;  %v4075_v61 = vld [vmem:[#allocation8 + $0x68] ss:$16 sps:$4 sm:$0xff]  }
  0xbd   : > { %1350 = vmatprep.subr.bf16.mxu0 %v4055_v31  ;;  %1391 = vmatprep.subr.bf16.mxu1 %v4057_v60  ;;  %4798 = vst [vmem:[#allocation64_spill] sm:$0xff] %v4075_v61  ;;  %v4081_v60 = vld [vmem:[#allocation8 + $0x44] ss:$16 sps:$4 sm:$0xff]   ;;  %v4087_v31 = vld [vmem:[#allocation8 + $0x48] ss:$16 sps:$4 sm:$0xff]  }
  0xbe   : > { %4799 = vst [vmem:[#allocation65_spill] sm:$0xff] %v4081_v60  ;;  %4802 = vst [vmem:[#allocation68_spill] sm:$0xff] %v4087_v31 }
  0xc0   : > { %1351 = vmatpush1.bf16.msra.mxu0 %v4061_v29  ;;  %1392 = vmatpush1.bf16.msra.mxu1 %v4063_v0  ;;  %v4083_v29 = vld [vmem:[#allocation8 + $0x4c] ss:$16 sps:$4 sm:$0xff]   ;;  %v4085_v0 = vld [vmem:[#allocation8 + $0x40] ss:$16 sps:$4 sm:$0xff]  }
  0xc1   : > { %1352 = vmatprep.subr.bf16.mxu0 %v4069_v42  ;;  %1393 = vmatprep.subr.bf16.mxu1 %v4071_v1  ;;  %4800 = vst [vmem:[#allocation66_spill] sm:$0xff] %v4083_v29  ;;  %4801 = vst [vmem:[#allocation67_spill] sm:$0xff] %v4085_v0  ;;  %v4093_v1 = vld [vmem:[#allocation8 + $0x24] ss:$16 sps:$4 sm:$0xff]   ;;  %v4099_v42 = vld [vmem:[#allocation8 + $0x28] ss:$16 sps:$4 sm:$0xff]  }
  0xc2   : > { %4803 = vst [vmem:[#allocation69_spill] sm:$0xff] %v4093_v1  ;;  %4806 = vst [vmem:[#allocation72_spill] sm:$0xff] %v4099_v42 }
  0xc4   : > { %1353 = vmatpush1.bf16.msra.mxu0 %v4073_v4  ;;  %1394 = vmatpush1.bf16.msra.mxu1 %v4075_v61  ;;  %v4095_v4 = vld [vmem:[#allocation8 + $0x2c] ss:$16 sps:$4 sm:$0xff]   ;;  %v4097_v61 = vld [vmem:[#allocation8 + $0x20] ss:$16 sps:$4 sm:$0xff]  }
  0xc5   : > { %1354 = vmatprep.subr.bf16.mxu0 %v4081_v60  ;;  %1395 = vmatprep.subr.bf16.mxu1 %v4083_v29  ;;  %4804 = vst [vmem:[#allocation70_spill] sm:$0xff] %v4095_v4  ;;  %4805 = vst [vmem:[#allocation71_spill] sm:$0xff] %v4097_v61  ;;  %v4105_v29 = vld [vmem:[#allocation8 + $0x4] ss:$16 sps:$4 sm:$0xff]   ;;  %v4111_v60 = vld [vmem:[#allocation8 + $0x8] ss:$16 sps:$4 sm:$0xff]  }
  0xc6   : > { %4807 = vst [vmem:[#allocation73_spill] sm:$0xff] %v4105_v29  ;;  %4810 = vst [vmem:[#allocation76_spill] sm:$0xff] %v4111_v60 }
  0xc8   : > { %1355 = vmatpush1.bf16.msra.mxu0 %v4085_v0  ;;  %1396 = vmatpush1.bf16.msra.mxu1 %v4087_v31  ;;  %v4107_v0 = vld [vmem:[#allocation8 + $0xc] ss:$16 sps:$4 sm:$0xff]   ;;  %v4109_v31 = vld [vmem:[#allocation8] ss:$16 sps:$4 sm:$0xff]  }
  0xc9   : > { %1356 = vmatprep.subr.bf16.mxu0 %v4093_v1  ;;  %1397 = vmatprep.subr.bf16.mxu1 %v4095_v4  ;;  %4808 = vst [vmem:[#allocation74_spill] sm:$0xff] %v4107_v0  ;;  %4809 = vst [vmem:[#allocation75_spill] sm:$0xff] %v4109_v31 }
  0xcc   : > { %1357 = vmatpush1.bf16.msra.mxu0 %v4097_v61  ;;  %1398 = vmatpush1.bf16.msra.mxu1 %v4099_v42  ;;  %v626_v42 = vlaneseq  ;;  %v3594_v61 = vmov 1983009808  }
  0xcd   : > { %1358 = vmatprep.subr.bf16.mxu0 %v4105_v29  ;;  %1399 = vmatprep.subr.bf16.mxu1 %v4107_v0  ;;  %v905_v4 = vunpack.c.l.s4 %v3594_v61 }
  0xce   : > { %v4119_v1 = vshrl.u32 %v626_v42, 7 }
  0xcf   : > { %v906_v62 = vunpack.c.0.s8 %v905_v4 }
  0xd0   : > { %1359 = vmatpush1.bf16.msra.mxu0 %v4109_v31  ;;  %1400 = vmatpush1.bf16.msra.mxu1 %v4111_v60  ;;  %4811 = vst [vmem:[#allocation77_spill] sm:$0xff] %v4119_v1 }
  0xd1   : > { %1470 = vmatprep.subr.bf16.mxu0 %v3819_v2  ;;  %1511 = vmatprep.subr.bf16.mxu1 %v3821_v3  ;;  %v4122_v29 = vsub.s32 %v906_v62, %v4119_v1 }
 0x153   : > { %v850_v63 = vpop.f32.mrf.mxu0  ;;  %v891_v59 = vpop.f32.mrf.mxu1 }
 0x155   : > { %v852_v0 = vpop.f32.mrf.mxu0  ;;  %v893_v31 = vpop.f32.mrf.mxu1 }
 0x156   : > { %v902_v57 = vcombine.low %v850_v63, %v852_v0  ;;  %v903_v60 = vcombine.low %v891_v59, %v893_v31  ;;  %v647_v59 = vld [vmem:[#allocation14] sm:$0x3] }
 0x157   : > { %v854_v56 = vpop.f32.mrf.mxu0  ;;  %v895_v2 = vpop.f32.mrf.mxu1 }
 0x158   : > { %v910_v3 = vrot.slane %v902_v57, %v4122_v29  ;;  %v917_v61 = vrot.slane %v903_v60, %v4122_v29 }
 0x159   : > { %v855_v42 = vpop.f32.mrf.mxu0  ;;  %v896_v54 = vpop.f32.mrf.mxu1 }
 0x15a   : > { %v918_v4 = vcombine.low %v910_v3, %v917_v61  ;;  %v4825_v3 = vld [vmem:[#allocation38_spill] sm:$0xff]  ;;  %v4826_v61 = vld [vmem:[#allocation39_spill] sm:$0xff]  ;;  %v4827_v42 = vld [vmem:[#allocation40_spill] sm:$0xff] }
 0x15c   : > { %v920_v53 = vadd.f32 %v918_v4, %v654_v55  ;;  %v4828_v4 = vld [vmem:[#allocation41_spill] sm:$0xff] }
 0x15e   : > { %v2747_v52 = vmul.f32 -1.442695, %v920_v53  ;;  %v928_v51 = vrot.slane %v920_v53, 6  ;;  %v4823_v53 = vld [vmem:[#allocation36_spill] sm:$0xff] }
 0x160   : > { %3120 = vpow2.f32 %v2747_v52  ;;  %v4822_v52 = vld [vmem:[#allocation35_spill] sm:$0xff] }
 0x16d   : > { %v3121_v62 = vpop.eup %3120 }
 0x16e   : > { %v924_v1 = vadd.f32 1.0, %v3121_v62  ;;  %v4829_v62 = vld [vmem:[#allocation42_spill] sm:$0xff] }
 0x170   : > { %3122 = vrcp.f32 %v924_v1  ;;  %v4824_v1 = vld [vmem:[#allocation37_spill] sm:$0xff] }
 0x171   : > { %3124 = vtanh.f32 %v928_v51  ;;  %v4821_v51 = vld [vmem:[#allocation34_spill] sm:$0xff] }
 0x17d   : > { %v3123_v63 = vpop.eup %3122 }
 0x17e   : > { %v932_v56 = vrot.slane %v3123_v63, 2  ;;  %v3125_v31 = vpop.eup %3124  ;;  %v938_v54 = vrot.slane %v3123_v63, 4 }
 0x17f   : > { %v935_v57 = vmul.f32 %v3125_v31, %v3123_v63  ;;  %v4830_v63 = vld [vmem:[#allocation43_spill] sm:$0xff]  ;;  %v4833_v31 = vld [vmem:[#allocation46_spill] sm:$0xff] }
 0x180   : > { %v934_v0 = vmul.f32 %v932_v56, %v647_v59  ;;  %v4831_v59 = vld [vmem:[#allocation44_spill] sm:$0xff]  ;;  %v4832_v56 = vld [vmem:[#allocation45_spill] sm:$0xff] }
 0x182   : > { %v4127_v58 = vadd.f32 %v935_v57, %v934_v0  ;;  %v4834_v0 = vld [vmem:[#allocation77_spill] sm:$0xff] }
 0x183   : > { %v628_v57 = vsub.s32 0, %v4834_v0 }
 0x184   : > { %3126 = vtanh.f32 %v4127_v58 }
 0x191   : > { %v3127_v60 = vpop.eup %3126 }
 0x192   : > { %v940_v55 = vmul.f32 %v3127_v60, %v938_v54  ;;  %v624_v54 = vld [vmem:[%s4599_s7] sm:$0xf]  ;;  %v632_v60 = vsub.s32 1, %v4834_v0 }
 0x194   : > { %v1183_v2 = vpack.c.bf16 %v940_v55, %v940_v55 }
 0x196   : > { %1377 = vmatmul.mubr.bf16.vlgmr.msra.gmra.mxu0 %v1183_v2  ;;  %1418 = vmatmul.mubr.bf16.vlgmr.msra.gmra.mxu1 %v1183_v2  ;;  %v4212_v2 = vrot.slane %v624_v54, %v632_v60 }
 0x197   : > { %1471 = vmatpush1.bf16.msra.mxu0 %v3826_v5  ;;  %1512 = vmatpush1.bf16.msra.mxu1 %v3828_v6  ;;  %v4156_v5 = vpop.permute.xlu0 %1458 }
 0x198   : > { %1472 = vmatprep.subr.bf16.mxu0 %v3832_v7  ;;  %1513 = vmatprep.subr.bf16.mxu1 %v3837_v8  ;;  %v1461_v6 = vmul.f32 %v4156_v5, %v940_v55  ;;  %v1135_v7 = vpop.f32.mrf.mxu0  ;;  %v4163_v8 = vpop.f32.mrf.mxu1  ;;  %v4210_v55 = vrot.slane %v624_v54, %v628_v57 }
 0x199   : > { %1502 = vmatprep.mubr.bf16.mxu0 %v4788_v37  ;;  %1543 = vmatprep.mubr.bf16.mxu1 %v4788_v37 }
 0x19b   : > { %1473 = vmatpush1.bf16.msra.mxu0 %v3839_v9  ;;  %1514 = vmatpush1.bf16.msra.mxu1 %v3842_v10  ;;  %v1137_v9 = vpop.f32.mrf.mxu0  ;;  %v4167_v10 = vpop.f32.mrf.mxu1 }
 0x19c   : > { %1474 = vmatprep.subr.bf16.mxu0 %v3845_v11  ;;  %1515 = vmatprep.subr.bf16.mxu1 %v3847_v12  ;;  %v1469_v11 = vpack.c.bf16 %v1461_v6, %v1461_v6  ;;  %v1136_v6 = vadd.f32 %v1135_v7, %v4210_v55  ;;  %v640_v7 = vsub.s32 3, %v4834_v0 }
 0x19d   : > { %v1139_v12 = vpop.f32.mrf.mxu0 }
 0x19f   : > { %1475 = vmatpush1.bf16.msra.mxu0 %v3849_v13  ;;  %1516 = vmatpush1.bf16.msra.mxu1 %v3851_v14  ;;  %v1180_v13 = vpop.f32.mrf.mxu1  ;;  %v1140_v14 = vpop.f32.mrf.mxu0 }
 0x1a0   : > { %1476 = vmatprep.subr.bf16.mxu0 %v3855_v15  ;;  %1517 = vmatprep.subr.bf16.mxu1 %v3859_v16  ;;  %v4812_v16 = vld [vmem:[#allocation25_spill] sm:$0xff]  ;;  %v636_v13 = vsub.s32 2, %v4834_v0  ;;  %v1138_v14 = vadd.f32 %v1137_v9, %v4212_v2 }
 0x1a1   : > { %v1181_v15 = vpop.f32.mrf.mxu1  ;;  %4835 = vst [vmem:[#allocation25_spill] sm:$0xff] %v4210_v55 }
 0x1a2   : > { %v4218_v57 = vrot.slane %v624_v54, %v636_v13 }
 0x1a3   : > { %1477 = vmatpush1.bf16.msra.mxu0 %v3861_v17  ;;  %1518 = vmatpush1.bf16.msra.mxu1 %v3865_v18  ;;  %v4813_v17 = vld [vmem:[#allocation26_spill] sm:$0xff]  ;;  %v4814_v18 = vld [vmem:[#allocation27_spill] sm:$0xff] }
 0x1a4   : > { %1478 = vmatprep.subr.bf16.mxu0 %v3867_v19  ;;  %1519 = vmatprep.subr.bf16.mxu1 %v3871_v20  ;;  %v4815_v19 = vld [vmem:[#allocation28_spill] sm:$0xff]  ;;  %v4816_v20 = vld [vmem:[#allocation29_spill] sm:$0xff]  ;;  %4836 = vst [vmem:[#allocation26_spill] sm:$0xff] %v4212_v2  ;;  %4837 = vst [vmem:[#allocation27_spill] sm:$0xff] %v4218_v57  ;;  %v1177_v9 = vadd.f32 %v4163_v8, %v4218_v57 }
 0x1a7   : > { %1479 = vmatpush1.bf16.msra.mxu0 %v3873_v21  ;;  %1520 = vmatpush1.bf16.msra.mxu1 %v3875_v22  ;;  %v4817_v21 = vld [vmem:[#allocation30_spill] sm:$0xff]  ;;  %v4818_v22 = vld [vmem:[#allocation31_spill] sm:$0xff] }
 0x1a8   : > { %1480 = vmatprep.subr.bf16.mxu0 %v3879_v23  ;;  %1521 = vmatprep.subr.bf16.mxu1 %v3883_v24  ;;  %v4819_v23 = vld [vmem:[#allocation32_spill] sm:$0xff]  ;;  %v4820_v24 = vld [vmem:[#allocation33_spill] sm:$0xff] }
 0x1ab   : > { %1481 = vmatpush1.bf16.msra.mxu0 %v3887_v25  ;;  %1522 = vmatpush1.bf16.msra.mxu1 %v3889_v26 }
 0x1ac   : > { %1482 = vmatprep.subr.bf16.mxu0 %v3893_v27  ;;  %1523 = vmatprep.subr.bf16.mxu1 %v3895_v28 }
 0x1af   : > { %1483 = vmatpush1.bf16.msra.mxu0 %v3898_v30  ;;  %1524 = vmatpush1.bf16.msra.mxu1 %v3903_v32 }
 0x1b0   : > { %1484 = vmatprep.subr.bf16.mxu0 %v3905_v33  ;;  %1525 = vmatprep.subr.bf16.mxu1 %v3907_v34 }
 0x1b3   : > { %1485 = vmatpush1.bf16.msra.mxu0 %v3911_v35  ;;  %1526 = vmatpush1.bf16.msra.mxu1 %v3913_v36 }
 0x1b4   : > { %1595 = vmatprep.subr.bf16.mxu0 %v3915_v38  ;;  %1636 = vmatprep.subr.bf16.mxu1 %v3917_v39 }
 0x1b6   : > { %1503 = vmatmul.mubr.bf16.vlgmr.msra.gmra.mxu0 %v1469_v11  ;;  %1544 = vmatmul.mubr.bf16.vlgmr.msra.gmra.mxu1 %v1469_v11 }
 0x1b7   : > { %1596 = vmatpush1.bf16.msra.mxu0 %v3923_v40  ;;  %1637 = vmatpush1.bf16.msra.mxu1 %v3925_v41 }
 0x1b8   : > { %1597 = vmatprep.subr.bf16.mxu0 %v3935_v43  ;;  %1638 = vmatprep.subr.bf16.mxu1 %v3937_v44 }
 0x1b9   : > { %1627 = vmatprep.mubr.bf16.mxu0 %v4788_v37  ;;  %1668 = vmatprep.mubr.bf16.mxu1 %v4788_v37 }
 0x1bb   : > { %1598 = vmatpush1.bf16.msra.mxu0 %v3941_v45  ;;  %1639 = vmatpush1.bf16.msra.mxu1 %v3943_v46 }
 0x1bc   : > { %1599 = vmatprep.subr.bf16.mxu0 %v3947_v47  ;;  %1640 = vmatprep.subr.bf16.mxu1 %v3949_v48 }
 0x1bf   : > { %1600 = vmatpush1.bf16.msra.mxu0 %v3951_v49  ;;  %1641 = vmatpush1.bf16.msra.mxu1 %v3953_v50 }
 0x1c0   : > { %1601 = vmatprep.subr.bf16.mxu0 %v4812_v16  ;;  %1642 = vmatprep.subr.bf16.mxu1 %v4813_v17 }
 0x1c3   : > { %1602 = vmatpush1.bf16.msra.mxu0 %v4814_v18  ;;  %1643 = vmatpush1.bf16.msra.mxu1 %v4815_v19 }
 0x1c4   : > { %1603 = vmatprep.subr.bf16.mxu0 %v4816_v20  ;;  %1644 = vmatprep.subr.bf16.mxu1 %v4817_v21 }
 0x1c7   : > { %1604 = vmatpush1.bf16.msra.mxu0 %v4818_v22  ;;  %1645 = vmatpush1.bf16.msra.mxu1 %v4819_v23 }
 0x1c8   : > { %1605 = vmatprep.subr.bf16.mxu0 %v4820_v24  ;;  %1646 = vmatprep.subr.bf16.mxu1 %v4821_v51 }
 0x1cb   : > { %1606 = vmatpush1.bf16.msra.mxu0 %v4822_v52  ;;  %1647 = vmatpush1.bf16.msra.mxu1 %v4823_v53 }
 0x1cc   : > { %1607 = vmatprep.subr.bf16.mxu0 %v4824_v1  ;;  %1648 = vmatprep.subr.bf16.mxu1 %v4825_v3 }
 0x1cf   : > { %1608 = vmatpush1.bf16.msra.mxu0 %v4826_v61  ;;  %1649 = vmatpush1.bf16.msra.mxu1 %v4827_v42 }
 0x1d0   : > { %1609 = vmatprep.subr.bf16.mxu0 %v4828_v4  ;;  %1650 = vmatprep.subr.bf16.mxu1 %v4829_v62  ;;  %v2828_v62 = vld [vmem:[%s3814_s29 + $0x4] sm:$0x3] }
 0x1d1   : > { %2130 = vperm.xlu1 %2975, %v2828_v62  }
 0x1d3   : > { %1610 = vmatpush1.bf16.msra.mxu0 %v4830_v63  ;;  %1651 = vmatpush1.bf16.msra.mxu1 %v4831_v59 }
 0x1d4   : > { %1678 = vmatprep.subr.bf16.mxu0 %v4832_v56  ;;  %1719 = vmatprep.subr.bf16.mxu1 %v4833_v31 }
 0x256   : > { %v1378_v11 = vpop.f32.mrf.mxu0  ;;  %v1419_v12 = vpop.f32.mrf.mxu1 }
 0x257   : > { %v1426_v15 = vadd.f32 %v1378_v11, %v1136_v6  ;;  %v4223_v6 = vrot.slane %v624_v54, %v640_v7  ;;  %v1428_v11 = vadd.f32 %v1419_v12, %v1177_v9  ;;  %v651_v12 = vld [vmem:[#allocation14 + $0x2] sm:$0x3] }
 0x258   : > { %v1380_v31 = vpop.f32.mrf.mxu0  ;;  %v1421_v56 = vpop.f32.mrf.mxu1 }
 0x259   : > { %v2812_v59 = vmul.f32 -1.442695, %v1426_v15  ;;  %v1427_v63 = vadd.f32 %v1380_v31, %v1138_v14  ;;  %4838 = vst [vmem:[#allocation28_spill] sm:$0xff] %v4223_v6  ;;  %v4228_v15 = vld [vmem:[%s3809_s3 + $0x4] sm:$0xff]  }
 0x25a   : > { %v1382_v4 = vpop.f32.mrf.mxu0  ;;  %v1423_v42 = vpop.f32.mrf.mxu1 }
 0x25b   : > { %3128 = vpow2.f32 %v2812_v59  ;;  %v2813_v60 = vmul.f32 -1.442695, %v1427_v63  ;;  %v1179_v4 = vadd.f32 %v4167_v10, %v4223_v6  ;;  %v2814_v42 = vmul.f32 -1.442695, %v1428_v11 }
 0x25c   : > { %v1383_v55 = vpop.f32.mrf.mxu0  ;;  %v1424_v61 = vpop.f32.mrf.mxu1 }
 0x25d   : > { %3130 = vpow2.f32 %v2813_v60  ;;  %v1429_v62 = vadd.f32 %v1421_v56, %v1179_v4 }
 0x25e   : > { %3132 = vpow2.f32 %v2814_v42 }
 0x25f   : > { %3134 = vtanh.f32 %v1429_v62 }
 0x268   : > { %v3129_v31 = vpop.eup %3128 }
 0x269   : > { %v1439_v59 = vadd.f32 1.0, %v3129_v31 }
 0x26a   : > { %v3131_v63 = vpop.eup %3130 }
 0x26b   : > { %3136 = vrcp.f32 %v1439_v59  ;;  %v1440_v61 = vadd.f32 1.0, %v3131_v63  ;;  %v3133_v0 = vpop.eup %3132  ;;  %v1468_v59 = vunpack.c.l.bf16 %v4228_v15 }
 0x26c   : > { %v3135_v54 = vpop.eup %3134  ;;  %v1441_v11 = vadd.f32 1.0, %v3133_v0 }
 0x26d   : > { %3138 = vrcp.f32 %v1440_v61 }
 0x26e   : > { %3140 = vrcp.f32 %v1441_v11  ;;  %v4843_v11 = vld [vmem:[#allocation51_spill] sm:$0xff] }
 0x276   : > { %v1504_v55 = vpop.f32.mrf.mxu0  ;;  %v1545_v8 = vpop.f32.mrf.mxu1 }
 0x278   : > { %v3137_v13 = vpop.eup %3136  ;;  %v1506_v14 = vpop.f32.mrf.mxu0 }
 0x279   : > { %v1547_v10 = vpop.f32.mrf.mxu1  ;;  %v1450_v56 = vmul.f32 %v3137_v13, %v3135_v54  ;;  %v1556_v60 = vcombine.low %v1504_v55, %v1506_v14 }
 0x27a   : > { %v1557_v7 = vcombine.low %v1545_v8, %v1547_v10  ;;  %v3139_v9 = vpop.eup %3138  ;;  %v1508_v4 = vpop.f32.mrf.mxu0 }
 0x27b   : > { %v1549_v42 = vpop.f32.mrf.mxu1  ;;  %v1449_v62 = vmul.f32 %v3139_v9, %v651_v12  ;;  %v1564_v31 = vrot.slane %v1556_v60, %v4122_v29  ;;  %v3141_v8 = vpop.eup %3140  ;;  %v4842_v9 = vld [vmem:[#allocation50_spill] sm:$0xff]  ;;  %v4844_v4 = vld [vmem:[#allocation52_spill] sm:$0xff] }
 0x27c   : > { %v1571_v63 = vrot.slane %v1557_v7, %v4122_v29  ;;  %v1509_v61 = vpop.f32.mrf.mxu0  ;;  %v4845_v42 = vld [vmem:[#allocation53_spill] sm:$0xff] }
 0x27d   : > { %v1550_v6 = vpop.f32.mrf.mxu1  ;;  %v4233_v57 = vadd.f32 %v1450_v56, %v1449_v62  ;;  %v4840_v56 = vld [vmem:[#allocation48_spill] sm:$0xff]  ;;  %v4846_v62 = vld [vmem:[#allocation54_spill] sm:$0xff] }
 0x27e   : > { %v1572_v2 = vcombine.low %v1564_v31, %v1571_v63  ;;  %v4839_v6 = vld [vmem:[#allocation47_spill] sm:$0xff]  ;;  %v4849_v63 = vld [vmem:[#allocation57_spill] sm:$0xff]  ;;  %v4850_v61 = vld [vmem:[#allocation58_spill] sm:$0xff] }
 0x27f   : > { %3142 = vtanh.f32 %v4233_v57  ;;  %v4847_v31 = vld [vmem:[#allocation55_spill] sm:$0xff] }
 0x280   : > { %v1574_v55 = vadd.f32 %v1572_v2, %v1468_v59  ;;  %v4841_v2 = vld [vmem:[#allocation49_spill] sm:$0xff]  ;;  %v4848_v59 = vld [vmem:[#allocation56_spill] sm:$0xff] }
 0x282   : > { %v2816_v0 = vmul.f32 -1.442695, %v1574_v55  ;;  %v1582_v60 = vrot.slane %v1574_v55, 6 }
 0x284   : > { %3144 = vpow2.f32 %v2816_v0  ;;  %v4851_v0 = vld [vmem:[#allocation59_spill] sm:$0xff] }
 0x28c   : > { %v3143_v54 = vpop.eup %3142 }
 0x28d   : > { %v1453_v13 = vmul.f32 %v3143_v54, %v3141_v8  ;;  %v4852_v8 = vld [vmem:[#allocation60_spill] sm:$0xff]  ;;  %v1462_v54 = vmul.f32 %v4156_v5, %v4127_v58  ;;  %v4859_v58 = vld [vmem:[#allocation67_spill] sm:$0xff] }
 0x28f   : > { %1454 = vst [vmem:[%s3816_s30] sm:$0x3] %v1453_v13  ;;  %v1463_v12 = vmul.f32 %v4156_v5, %v1453_v13 }
 0x291   : > { %v3145_v14 = vpop.eup %3144  ;;  %v1465_v7 = vpack.c.bf16 %v1463_v12, %v1463_v12  ;;  %v4853_v12 = vld [vmem:[#allocation61_spill] sm:$0xff] }
 0x292   : > { %v1578_v10 = vadd.f32 1.0, %v3145_v14  ;;  %v4854_v14 = vld [vmem:[#allocation62_spill] sm:$0xff] }
 0x293   : > { %1628 = vmatmul.mubr.bf16.vlgmr.msra.gmra.mxu0 %v1465_v7  ;;  %1669 = vmatmul.mubr.bf16.vlgmr.msra.gmra.mxu1 %v1465_v7 }
 0x294   : > { %3146 = vrcp.f32 %v1578_v10  ;;  %1679 = vmatpush1.bf16.msra.mxu0 %v4839_v6  ;;  %1720 = vmatpush1.bf16.msra.mxu1 %v4840_v56 }
 0x295   : > { %3148 = vtanh.f32 %v1582_v60  ;;  %1680 = vmatprep.subr.bf16.mxu0 %v4841_v2  ;;  %1721 = vmatprep.subr.bf16.mxu1 %v4842_v9 }
 0x296   : > { %1710 = vmatprep.mubr.bf16.mxu0 %v4788_v37  ;;  %1751 = vmatprep.mubr.bf16.mxu1 %v4788_v37 }
 0x298   : > { %1681 = vmatpush1.bf16.msra.mxu0 %v4843_v11  ;;  %1722 = vmatpush1.bf16.msra.mxu1 %v4844_v4 }
 0x299   : > { %1682 = vmatprep.subr.bf16.mxu0 %v4845_v42  ;;  %1723 = vmatprep.subr.bf16.mxu1 %v4846_v62 }
 0x29c   : > { %1683 = vmatpush1.bf16.msra.mxu0 %v4847_v31  ;;  %1724 = vmatpush1.bf16.msra.mxu1 %v4848_v59  ;;  %v4855_v59 = vld [vmem:[#allocation63_spill] sm:$0xff] }
 0x29d   : > { %1684 = vmatprep.subr.bf16.mxu0 %v4849_v63  ;;  %1725 = vmatprep.subr.bf16.mxu1 %v4850_v61  ;;  %v4856_v63 = vld [vmem:[#allocation64_spill] sm:$0xff] }
 0x2a0   : > { %1685 = vmatpush1.bf16.msra.mxu0 %v4851_v0  ;;  %1726 = vmatpush1.bf16.msra.mxu1 %v4852_v8  ;;  %v4857_v0 = vld [vmem:[#allocation65_spill] sm:$0xff]  ;;  %v4858_v8 = vld [vmem:[#allocation66_spill] sm:$0xff] }
 0x2a1   : > { %v3147_v55 = vpop.eup %3146  ;;  %1686 = vmatprep.subr.bf16.mxu0 %v4853_v12  ;;  %1727 = vmatprep.subr.bf16.mxu1 %v4854_v14  ;;  %v4860_v12 = vld [vmem:[#allocation68_spill] sm:$0xff]  ;;  %v4861_v14 = vld [vmem:[#allocation69_spill] sm:$0xff] }
 0x2a2   : > { %v1586_v13 = vrot.slane %v3147_v55, 2  ;;  %v3149_v10 = vpop.eup %3148 }
 0x2a3   : > { %v1589_v7 = vmul.f32 %v3149_v10, %v3147_v55  ;;  %v4864_v10 = vld [vmem:[#allocation72_spill] sm:$0xff] }
 0x2a4   : > { %v1588_v60 = vmul.f32 %v1586_v13, %v1462_v54  ;;  %1687 = vmatpush1.bf16.msra.mxu0 %v4855_v59  ;;  %1728 = vmatpush1.bf16.msra.mxu1 %v4856_v63  ;;  %v4862_v54 = vld [vmem:[#allocation70_spill] sm:$0xff]  ;;  %v4863_v13 = vld [vmem:[#allocation71_spill] sm:$0xff] }
 0x2a5   : > { %1688 = vmatprep.subr.bf16.mxu0 %v4857_v0  ;;  %1729 = vmatprep.subr.bf16.mxu1 %v4858_v8  ;;  %v4867_v0 = vld [vmem:[#allocation75_spill] sm:$0xff]  ;;  %v4868_v8 = vld [vmem:[#allocation76_spill] sm:$0xff] }
 0x2a6   : > { %v4260_v61 = vadd.f32 %v1589_v7, %v1588_v60  ;;  %v4865_v60 = vld [vmem:[#allocation73_spill] sm:$0xff]  ;;  %v4866_v7 = vld [vmem:[#allocation74_spill] sm:$0xff] }
 0x2a7   : > { %v4275_v63 = vld [vmem:[#allocation7 + $0xe4] ss:$16 sps:$4 sm:$0xff]  }
 0x2a8   : > { %3150 = vtanh.f32 %v4260_v61  ;;  %1689 = vmatpush1.bf16.msra.mxu0 %v4859_v58  ;;  %1730 = vmatpush1.bf16.msra.mxu1 %v4860_v12  ;;  %4869 = vst [vmem:[#allocation29_spill] sm:$0xff] %v4275_v63  ;;  %v4278_v12 = vld [vmem:[#allocation7 + $0xec] ss:$16 sps:$4 sm:$0xff]  }
 0x2a9   : > { %1690 = vmatprep.subr.bf16.mxu0 %v4861_v14  ;;  %1731 = vmatprep.subr.bf16.mxu1 %v4862_v54  ;;  %v1592_v54 = vrot.slane %v3147_v55, 4  ;;  %v4295_v55 = vld [vmem:[#allocation7 + $0xc0] ss:$16 sps:$4 sm:$0xff]  }
 0x2aa   : > { %4872 = vst [vmem:[#allocation32_spill] sm:$0xff] %v4295_v55 }
 0x2ac   : > { %1691 = vmatpush1.bf16.msra.mxu0 %v4863_v13  ;;  %1732 = vmatpush1.bf16.msra.mxu1 %v4864_v10 }
 0x2ad   : > { %1692 = vmatprep.subr.bf16.mxu0 %v4865_v60  ;;  %1733 = vmatprep.subr.bf16.mxu1 %v4866_v7  ;;  %v4281_v60 = vld [vmem:[#allocation7 + $0xe0] ss:$16 sps:$4 sm:$0xff]  }
 0x2b0   : > { %1693 = vmatpush1.bf16.msra.mxu0 %v4867_v0  ;;  %1734 = vmatpush1.bf16.msra.mxu1 %v4868_v8  ;;  %v4284_v0 = vld [vmem:[#allocation7 + $0xe8] ss:$16 sps:$4 sm:$0xff]   ;;  %v4287_v8 = vld [vmem:[#allocation7 + $0xc4] ss:$16 sps:$4 sm:$0xff]  }
 0x2b1   : > { %1806 = vmatprep.subr.bf16.mxu0 %v4275_v63  ;;  %1847 = vmatprep.subr.bf16.mxu1 %v4278_v12  ;;  %4870 = vst [vmem:[#allocation30_spill] sm:$0xff] %v4287_v8  ;;  %v4290_v63 = vld [vmem:[#allocation7 + $0xcc] ss:$16 sps:$4 sm:$0xff]  }
 0x2b2   : > { %4871 = vst [vmem:[#allocation31_spill] sm:$0xff] %v4290_v63 }
 0x2b5   : > { %v3151_v13 = vpop.eup %3150 }
 0x2b6   : > { %v1594_v14 = vmul.f32 %v3151_v13, %v1592_v54  ;;  %v4298_v54 = vld [vmem:[#allocation7 + $0xc8] ss:$16 sps:$4 sm:$0xff]   ;;  %v4301_v13 = vld [vmem:[#allocation7 + $0xa4] ss:$16 sps:$4 sm:$0xff]  }
 0x2b7   : > { %4873 = vst [vmem:[#allocation33_spill] sm:$0xff] %v4298_v54  ;;  %4874 = vst [vmem:[#allocation34_spill] sm:$0xff] %v4301_v13 }
 0x2b8   : > { %v1677_v10 = vpack.c.bf16 %v1594_v14, %v1594_v14 }
 0x2ba   : > { %1711 = vmatmul.mubr.bf16.vlgmr.msra.gmra.mxu0 %v1677_v10  ;;  %1752 = vmatmul.mubr.bf16.vlgmr.msra.gmra.mxu1 %v1677_v10  ;;  %v4304_v10 = vld [vmem:[#allocation7 + $0xac] ss:$16 sps:$4 sm:$0xff]  }
 0x2bb   : > { %1807 = vmatpush1.bf16.msra.mxu0 %v4281_v60  ;;  %1848 = vmatpush1.bf16.msra.mxu1 %v4284_v0  ;;  %4875 = vst [vmem:[#allocation35_spill] sm:$0xff] %v4304_v10 }
 0x2bc   : > { %1808 = vmatprep.subr.bf16.mxu0 %v4287_v8  ;;  %1849 = vmatprep.subr.bf16.mxu1 %v4290_v63  ;;  %v4307_v63 = vld [vmem:[#allocation7 + $0xa0] ss:$16 sps:$4 sm:$0xff]   ;;  %v4310_v8 = vld [vmem:[#allocation7 + $0xa8] ss:$16 sps:$4 sm:$0xff]  }
 0x2bd   : > { %1838 = vmatprep.mubr.bf16.mxu0 %v4788_v37  ;;  %1879 = vmatprep.mubr.bf16.mxu1 %v4788_v37  ;;  %4876 = vst [vmem:[#allocation36_spill] sm:$0xff] %v4307_v63  ;;  %4877 = vst [vmem:[#allocation37_spill] sm:$0xff] %v4310_v8 }
 0x2bf   : > { %1809 = vmatpush1.bf16.msra.mxu0 %v4295_v55  ;;  %1850 = vmatpush1.bf16.msra.mxu1 %v4298_v54  ;;  %v4313_v55 = vld [vmem:[#allocation7 + $0x84] ss:$16 sps:$4 sm:$0xff]   ;;  %v4316_v54 = vld [vmem:[#allocation7 + $0x8c] ss:$16 sps:$4 sm:$0xff]  }
 0x2c0   : > { %1810 = vmatprep.subr.bf16.mxu0 %v4301_v13  ;;  %1851 = vmatprep.subr.bf16.mxu1 %v4304_v10  ;;  %4878 = vst [vmem:[#allocation38_spill] sm:$0xff] %v4313_v55  ;;  %4879 = vst [vmem:[#allocation77_spill] sm:$0xff] %v4316_v54  ;;  %v4319_v13 = vld [vmem:[#allocation7 + $0x80] ss:$16 sps:$4 sm:$0xff]   ;;  %v4322_v10 = vld [vmem:[#allocation7 + $0x88] ss:$16 sps:$4 sm:$0xff]  }
 0x2c1   : > { %4880 = vst [vmem:[#allocation47_spill] sm:$0xff] %v4319_v13  ;;  %4881 = vst [vmem:[#allocation48_spill] sm:$0xff] %v4322_v10 }
 0x2c3   : > { %1811 = vmatpush1.bf16.msra.mxu0 %v4307_v63  ;;  %1852 = vmatpush1.bf16.msra.mxu1 %v4310_v8  ;;  %v4325_v63 = vld [vmem:[#allocation7 + $0x64] ss:$16 sps:$4 sm:$0xff]   ;;  %v4328_v8 = vld [vmem:[#allocation7 + $0x6c] ss:$16 sps:$4 sm:$0xff]  }
 0x2c4   : > { %1812 = vmatprep.subr.bf16.mxu0 %v4313_v55  ;;  %1853 = vmatprep.subr.bf16.mxu1 %v4316_v54  ;;  %v4331_v55 = vld [vmem:[#allocation7 + $0x60] ss:$16 sps:$4 sm:$0xff]   ;;  %v4334_v54 = vld [vmem:[#allocation7 + $0x68] ss:$16 sps:$4 sm:$0xff]  }
 0x2c5   : > { %4882 = vst [vmem:[#allocation49_spill] sm:$0xff] %v4331_v55 }
 0x2c7   : > { %1813 = vmatpush1.bf16.msra.mxu0 %v4319_v13  ;;  %1854 = vmatpush1.bf16.msra.mxu1 %v4322_v10  ;;  %v4337_v13 = vld [vmem:[#allocation7 + $0x44] ss:$16 sps:$4 sm:$0xff]   ;;  %v4340_v10 = vld [vmem:[#allocation7 + $0x4c] ss:$16 sps:$4 sm:$0xff]  }
 0x2c8   : > { %1814 = vmatprep.subr.bf16.mxu0 %v4325_v63  ;;  %1855 = vmatprep.subr.bf16.mxu1 %v4328_v8  ;;  %4883 = vst [vmem:[#allocation50_spill] sm:$0xff] %v4340_v10 }
 0x2cb   : > { %1815 = vmatpush1.bf16.msra.mxu0 %v4331_v55  ;;  %1856 = vmatpush1.bf16.msra.mxu1 %v4334_v54  ;;  %v4347_v55 = vpop.permute.xlu0 %1794 }
 0x2cc   : > { %1816 = vmatprep.subr.bf16.mxu0 %v4337_v13  ;;  %1857 = vmatprep.subr.bf16.mxu1 %v4340_v10  ;;  %v1797_v10 = vmul.f32 %v4347_v55, %v1594_v14 }
 0x2cf   : > { %1817 = vmatpush1.bf16.msra.mxu0 %v3887_v25  ;;  %1858 = vmatpush1.bf16.msra.mxu1 %v3889_v26  ;;  %v1805_v25 = vpack.c.bf16 %v1797_v10, %v1797_v10  ;;  %v4884_v26 = vld [vmem:[#allocation39_spill] sm:$0xff]  ;;  %v4895_v10 = vld [vmem:[#allocation28_spill] sm:$0xff] }
 0x2d0   : > { %1818 = vmatprep.subr.bf16.mxu0 %v3893_v27  ;;  %1859 = vmatprep.subr.bf16.mxu1 %v3895_v28  ;;  %v4885_v27 = vld [vmem:[#allocation40_spill] sm:$0xff]  ;;  %v4886_v28 = vld [vmem:[#allocation41_spill] sm:$0xff] }
 0x2d3   : > { %1819 = vmatpush1.bf16.msra.mxu0 %v3898_v30  ;;  %1860 = vmatpush1.bf16.msra.mxu1 %v3903_v32  ;;  %v4887_v30 = vld [vmem:[#allocation42_spill] sm:$0xff]  ;;  %v4888_v32 = vld [vmem:[#allocation43_spill] sm:$0xff] }
 0x2d4   : > { %1820 = vmatprep.subr.bf16.mxu0 %v3905_v33  ;;  %1861 = vmatprep.subr.bf16.mxu1 %v3907_v34  ;;  %v4889_v33 = vld [vmem:[#allocation44_spill] sm:$0xff]  ;;  %v4890_v34 = vld [vmem:[#allocation45_spill] sm:$0xff] }
 0x2d7   : > { %1821 = vmatpush1.bf16.msra.mxu0 %v3911_v35  ;;  %1862 = vmatpush1.bf16.msra.mxu1 %v3913_v36  ;;  %v4891_v35 = vld [vmem:[#allocation46_spill] sm:$0xff]  ;;  %v2835_v36 = vld [vmem:[%s3814_s29 + $0x6] sm:$0x3]  ;;  %s3597_s29 = smov [#allocation11]  }
 0x2d8   : > { %1931 = vmatprep.subr.bf16.mxu0 %v3915_v38  ;;  %1972 = vmatprep.subr.bf16.mxu1 %v3917_v39  ;;  %s3446_s17 = sshll.u32 %s3597_s29, 4  ;;  %s3447_s17 = int_to_ptr.vmem [resolvable:$false] %s3446_s17 }
 0x2d9   : > { %2466 = vperm.xlu1 %2975, %v2835_v36   ;;  %s3448_s22 = scalar_lea.vmem %s3447_s17, 256  ;;  %p3449_p7 = scmp.lt.s32.totalorder %s4509_s28, %s3447_s17 }
 0x2da   : > { %1839 = vmatmul.mubr.bf16.vlgmr.msra.gmra.mxu0 %v1805_v25  ;;  %1880 = vmatmul.mubr.bf16.vlgmr.msra.gmra.mxu1 %v1805_v25  ;;  %p3450_p8 = scmp.lt.s32.totalorder %s3448_s22, %s3442_s26 }
 0x2db   : > { %1932 = vmatpush1.bf16.msra.mxu0 %v3923_v40  ;;  %1973 = vmatpush1.bf16.msra.mxu1 %v3925_v41 }
 0x2dc   : > { %1933 = vmatprep.subr.bf16.mxu0 %v3935_v43  ;;  %1974 = vmatprep.subr.bf16.mxu1 %v3937_v44  ;;  %p3451_p9 = por %p3450_p8, %p3449_p7 }
 0x2dd   : > { %1963 = vmatprep.mubr.bf16.mxu0 %v4788_v37  ;;  %2004 = vmatprep.mubr.bf16.mxu1 %v4788_v37 }
 0x2de   : > { %p3452_p2 = pnand %p3451_p9, %p3445_p6 }
 0x2df   : > { %1934 = vmatpush1.bf16.msra.mxu0 %v3941_v45  ;;  %1975 = vmatpush1.bf16.msra.mxu1 %v3943_v46 }
 0x2e0   : > { %1935 = vmatprep.subr.bf16.mxu0 %v3947_v47  ;;  %1976 = vmatprep.subr.bf16.mxu1 %v3949_v48  ;;  %v4892_v47 = vld [vmem:[#allocation25_spill] sm:$0xff] }
 0x2e3   : > { %1936 = vmatpush1.bf16.msra.mxu0 %v3951_v49  ;;  %1977 = vmatpush1.bf16.msra.mxu1 %v3953_v50 }
 0x2e4   : > { %1937 = vmatprep.subr.bf16.mxu0 %v4812_v16  ;;  %1978 = vmatprep.subr.bf16.mxu1 %v4813_v17  ;;  %v4893_v16 = vld [vmem:[#allocation26_spill] sm:$0xff] }
 0x2e7   : > { %1938 = vmatpush1.bf16.msra.mxu0 %v4814_v18  ;;  %1979 = vmatpush1.bf16.msra.mxu1 %v4815_v19 }
 0x2e8   : > { %1939 = vmatprep.subr.bf16.mxu0 %v4816_v20  ;;  %1980 = vmatprep.subr.bf16.mxu1 %v4817_v21 }
 0x2eb   : > { %1940 = vmatpush1.bf16.msra.mxu0 %v4818_v22  ;;  %1981 = vmatpush1.bf16.msra.mxu1 %v4819_v23 }
 0x2ec   : > { %1941 = vmatprep.subr.bf16.mxu0 %v4820_v24  ;;  %1982 = vmatprep.subr.bf16.mxu1 %v4821_v51 }
 0x2ef   : > { %1942 = vmatpush1.bf16.msra.mxu0 %v4822_v52  ;;  %1983 = vmatpush1.bf16.msra.mxu1 %v4823_v53 }
 0x2f0   : > { %1943 = vmatprep.subr.bf16.mxu0 %v4824_v1  ;;  %1984 = vmatprep.subr.bf16.mxu1 %v4825_v3  ;;  %v4894_v1 = vld [vmem:[#allocation27_spill] sm:$0xff] }
 0x2f3   : > { %1944 = vmatpush1.bf16.msra.mxu0 %v4884_v26  ;;  %1985 = vmatpush1.bf16.msra.mxu1 %v4885_v27 }
 0x2f4   : > { %1945 = vmatprep.subr.bf16.mxu0 %v4886_v28  ;;  %1986 = vmatprep.subr.bf16.mxu1 %v4887_v30 }
 0x2f7   : > { %1946 = vmatpush1.bf16.msra.mxu0 %v4888_v32  ;;  %1987 = vmatpush1.bf16.msra.mxu1 %v4889_v33 }
 0x2f8   : > { %2014 = vmatprep.subr.bf16.mxu0 %v4890_v34  ;;  %2055 = vmatprep.subr.bf16.mxu1 %v4891_v35 }
 0x353   : > { %v1629_v38 = vpop.f32.mrf.mxu0  ;;  %v1670_v39 = vpop.f32.mrf.mxu1 }
 0x354   : > { %v1630_v48 = vadd.f32 %v1629_v38, %v4892_v47  ;;  %v1671_v3 = vadd.f32 %v1670_v39, %v4894_v1 }
 0x355   : > { %v1631_v40 = vpop.f32.mrf.mxu0  ;;  %v1672_v41 = vpop.f32.mrf.mxu1 }
 0x356   : > { %v1632_v17 = vadd.f32 %v1631_v40, %v4893_v16  ;;  %v1673_v25 = vadd.f32 %v1672_v41, %v4895_v10  ;;  %v1464_v41 = vmul.f32 %v4156_v5, %v4233_v57 }
 0x357   : > { %v1633_v43 = vpop.f32.mrf.mxu0  ;;  %v1674_v44 = vpop.f32.mrf.mxu1 }
 0x359   : > { %v1634_v45 = vpop.f32.mrf.mxu0  ;;  %v1675_v46 = vpop.f32.mrf.mxu1 }
 0x37a   : > { %v1712_v49 = vpop.f32.mrf.mxu0  ;;  %v1753_v50 = vpop.f32.mrf.mxu1 }
 0x37b   : > { %v1760_v18 = vadd.f32 %v1712_v49, %v1630_v48  ;;  %v1762_v14 = vadd.f32 %v1753_v50, %v1671_v3  ;;  %v1804_v49 = vunpack.c.h.bf16 %v4228_v15 }
 0x37c   : > { %v1714_v19 = vpop.f32.mrf.mxu0  ;;  %v1755_v20 = vpop.f32.mrf.mxu1 }
 0x37d   : > { %v2817_v21 = vmul.f32 -1.442695, %v1760_v18  ;;  %v1761_v22 = vadd.f32 %v1714_v19, %v1632_v17  ;;  %v2819_v26 = vmul.f32 -1.442695, %v1762_v14  ;;  %v1763_v28 = vadd.f32 %v1755_v20, %v1673_v25 }
 0x37e   : > { %v1716_v23 = vpop.f32.mrf.mxu0  ;;  %v1757_v24 = vpop.f32.mrf.mxu1 }
 0x37f   : > { %3152 = vpow2.f32 %v2817_v21  ;;  %v2818_v51 = vmul.f32 -1.442695, %v1761_v22 }
 0x380   : > { %v1717_v52 = vpop.f32.mrf.mxu0  ;;  %v1758_v53 = vpop.f32.mrf.mxu1 }
 0x381   : > { %3154 = vpow2.f32 %v2818_v51 }
 0x382   : > { %3156 = vpow2.f32 %v2819_v26 }
 0x38c   : > { %v3153_v27 = vpop.eup %3152 }
 0x38d   : > { %v1773_v30 = vadd.f32 1.0, %v3153_v27 }
 0x38e   : > { %v3155_v32 = vpop.eup %3154 }
 0x38f   : > { %3158 = vrcp.f32 %v1773_v30  ;;  %v1774_v33 = vadd.f32 1.0, %v3155_v32  ;;  %v3157_v36 = vpop.eup %3156  ;;  %v4900_v30 = vld [vmem:[#allocation60_spill] sm:$0xff] }
 0x390   : > { %3160 = vtanh.f32 %v1763_v28  ;;  %v1775_v48 = vadd.f32 1.0, %v3157_v36  ;;  %v4899_v28 = vld [vmem:[#allocation59_spill] sm:$0xff]  ;;  %v4904_v36 = vld [vmem:[#allocation65_spill] sm:$0xff] }
 0x391   : > { %3162 = vrcp.f32 %v1774_v33 }
 0x392   : > { %3164 = vrcp.f32 %v1775_v48 }
 0x39a   : > { %v1840_v34 = vpop.f32.mrf.mxu0  ;;  %v1881_v35 = vpop.f32.mrf.mxu1 }
 0x39c   : > { %v3159_v38 = vpop.eup %3158  ;;  %v1842_v40 = vpop.f32.mrf.mxu0 }
 0x39d   : > { %v1883_v43 = vpop.f32.mrf.mxu1  ;;  %v3161_v39 = vpop.eup %3160  ;;  %v1892_v44 = vcombine.low %v1840_v34, %v1842_v40  ;;  %v4903_v34 = vld [vmem:[#allocation64_spill] sm:$0xff]  ;;  %v4907_v40 = vld [vmem:[#allocation69_spill] sm:$0xff] }
 0x39e   : > { %v1893_v45 = vcombine.low %v1881_v35, %v1883_v43  ;;  %v3163_v46 = vpop.eup %3162  ;;  %v1844_v50 = vpop.f32.mrf.mxu0  ;;  %v1784_v19 = vmul.f32 %v3161_v39, %v3159_v38  ;;  %v4905_v38 = vld [vmem:[#allocation66_spill] sm:$0xff]  ;;  %v4909_v39 = vld [vmem:[#allocation71_spill] sm:$0xff] }
 0x39f   : > { %v1885_v17 = vpop.f32.mrf.mxu1  ;;  %v1783_v18 = vmul.f32 %v3163_v46, %v1464_v41  ;;  %v1900_v20 = vrot.slane %v1892_v44, %v4122_v29  ;;  %v3165_v15 = vpop.eup %3164  ;;  %v4908_v43 = vld [vmem:[#allocation70_spill] sm:$0xff]  ;;  %v4911_v41 = vld [vmem:[#allocation73_spill] sm:$0xff]  ;;  %v4912_v44 = vld [vmem:[#allocation75_spill] sm:$0xff] }
 0x3a0   : > { %v1907_v21 = vrot.slane %v1893_v45, %v4122_v29  ;;  %v1845_v22 = vpop.f32.mrf.mxu0  ;;  %v4913_v45 = vld [vmem:[#allocation76_spill] sm:$0xff]  ;;  %v4914_v46 = vld [vmem:[#allocation29_spill] sm:$0xff]  ;;  %v4915_v17 = vld [vmem:[#allocation30_spill] sm:$0xff] }
 0x3a1   : > { %v1886_v23 = vpop.f32.mrf.mxu1  ;;  %v4402_v24 = vadd.f32 %v1784_v19, %v1783_v18  ;;  %v4917_v18 = vld [vmem:[#allocation32_spill] sm:$0xff]  ;;  %v4919_v19 = vld [vmem:[#allocation34_spill] sm:$0xff]  ;;  %v4924_v22 = vld [vmem:[#allocation77_spill] sm:$0xff] }
 0x3a2   : > { %v1908_v5 = vcombine.low %v1900_v20, %v1907_v21  ;;  %v4920_v20 = vld [vmem:[#allocation35_spill] sm:$0xff]  ;;  %v4921_v21 = vld [vmem:[#allocation36_spill] sm:$0xff] }
 0x3a3   : > { %3166 = vtanh.f32 %v4402_v24  ;;  %v4925_v23 = vld [vmem:[#allocation47_spill] sm:$0xff] }
 0x3a4   : > { %v1910_v57 = vadd.f32 %v1908_v5, %v1804_v49  ;;  %v4926_v5 = vld [vmem:[#allocation48_spill] sm:$0xff] }
 0x3a6   : > { %v2823_v51 = vmul.f32 -1.442695, %v1910_v57  ;;  %v1918_v26 = vrot.slane %v1910_v57, 6  ;;  %v4927_v57 = vld [vmem:[#allocation49_spill] sm:$0xff] }
 0x3a8   : > { %3168 = vpow2.f32 %v2823_v51  ;;  %v4928_v51 = vld [vmem:[#allocation50_spill] sm:$0xff] }
 0x3b0   : > { %v3167_v52 = vpop.eup %3166 }
 0x3b1   : > { %v1787_v53 = vmul.f32 %v3167_v52, %v3165_v15  ;;  %v3238_v15 = vld [vmem:[#allocation7 + $0x40] ss:$16 sps:$4 sm:$0xff]   ;;  %v3239_v52 = vld [vmem:[#allocation7 + $0x48] ss:$16 sps:$4 sm:$0xff]  }
 0x3b3   : > { %2820 = vst [vmem:[%s3816_s30 + $0x2] sm:$0x3] %v1787_v53  ;;  %v1799_v3 = vmul.f32 %v4347_v55, %v1787_v53  ;;  %v3240_v53 = vld [vmem:[#allocation7 + $0x24] ss:$16 sps:$4 sm:$0xff]  }
 0x3b5   : > { %v3169_v14 = vpop.eup %3168  ;;  %v1801_v27 = vpack.c.bf16 %v1799_v3, %v1799_v3  ;;  %v3241_v3 = vld [vmem:[#allocation7 + $0x2c] ss:$16 sps:$4 sm:$0xff]  }
 0x3b6   : > { %v1914_v25 = vadd.f32 1.0, %v3169_v14  ;;  %v4468_v14 = vpop.permute.xlu1 %2130 }
 0x3b7   : > { %1964 = vmatmul.mubr.bf16.vlgmr.msra.gmra.mxu0 %v1801_v27  ;;  %2005 = vmatmul.mubr.bf16.vlgmr.msra.gmra.mxu1 %v1801_v27  ;;  %v3247_v27 = vld [vmem:[#allocation7 + $0x8] ss:$16 sps:$4 sm:$0xff]  }
 0x3b8   : > { %3170 = vrcp.f32 %v1914_v25  ;;  %2015 = vmatpush1.bf16.msra.mxu0 %v4839_v6  ;;  %2056 = vmatpush1.bf16.msra.mxu1 %v4840_v56  ;;  %v4896_v6 = vld [vmem:[#allocation56_spill] sm:$0xff]  ;;  %v4897_v56 = vld [vmem:[#allocation57_spill] sm:$0xff] }
 0x3b9   : > { %3172 = vtanh.f32 %v1918_v26  ;;  %2016 = vmatprep.subr.bf16.mxu0 %v4841_v2  ;;  %2057 = vmatprep.subr.bf16.mxu1 %v4842_v9  ;;  %v4898_v2 = vld [vmem:[#allocation58_spill] sm:$0xff] }
 0x3ba   : > { %2046 = vmatprep.mubr.bf16.mxu0 %v4788_v37  ;;  %2087 = vmatprep.mubr.bf16.mxu1 %v4788_v37  ;;  %v3244_v25 = vld [vmem:[#allocation7 + $0x4] ss:$16 sps:$4 sm:$0xff]   ;;  %v3246_v26 = vld [vmem:[#allocation7] ss:$16 sps:$4 sm:$0xff]  }
 0x3bc   : > { %2017 = vmatpush1.bf16.msra.mxu0 %v4843_v11  ;;  %2058 = vmatpush1.bf16.msra.mxu1 %v4844_v4  ;;  %v1798_v11 = vmul.f32 %v4347_v55, %v4260_v61  ;;  %v4906_v61 = vld [vmem:[#allocation68_spill] sm:$0xff] }
 0x3bd   : > { %2018 = vmatprep.subr.bf16.mxu0 %v4845_v42  ;;  %2059 = vmatprep.subr.bf16.mxu1 %v4846_v62  ;;  %v4901_v42 = vld [vmem:[#allocation61_spill] sm:$0xff]  ;;  %v4902_v62 = vld [vmem:[#allocation62_spill] sm:$0xff] }
 0x3c0   : > { %2019 = vmatpush1.bf16.msra.mxu0 %v4847_v31  ;;  %2060 = vmatpush1.bf16.msra.mxu1 %v4896_v6 }
 0x3c1   : > { %2020 = vmatprep.subr.bf16.mxu0 %v4897_v56  ;;  %2061 = vmatprep.subr.bf16.mxu1 %v4898_v2  ;;  %v3248_v56 = vld [vmem:[#allocation10 + $0xe4] ss:$16 sps:$4 sm:$0xff]   ;;  %v3249_v2 = vld [vmem:[#allocation10 + $0xec] ss:$16 sps:$4 sm:$0xff]  }
 0x3c4   : > { %2021 = vmatpush1.bf16.msra.mxu0 %v4899_v28  ;;  %2062 = vmatpush1.bf16.msra.mxu1 %v4900_v30  ;;  %v3251_v28 = vld [vmem:[#allocation10 + $0xe8] ss:$16 sps:$4 sm:$0xff]   ;;  %v3252_v30 = vld [vmem:[#allocation10 + $0xc4] ss:$16 sps:$4 sm:$0xff]  }
 0x3c5   : > { %v3171_v9 = vpop.eup %3170  ;;  %2022 = vmatprep.subr.bf16.mxu0 %v4901_v42  ;;  %2063 = vmatprep.subr.bf16.mxu1 %v4902_v62  ;;  %v3255_v42 = vld [vmem:[#allocation10 + $0xc8] ss:$16 sps:$4 sm:$0xff]   ;;  %v3256_v62 = vld [vmem:[#allocation10 + $0xa4] ss:$16 sps:$4 sm:$0xff]  }
 0x3c6   : > { %v1922_v4 = vrot.slane %v3171_v9, 2  ;;  %v3173_v31 = vpop.eup %3172 }
 0x3c7   : > { %v1925_v33 = vmul.f32 %v3173_v31, %v3171_v9  ;;  %v3257_v31 = vld [vmem:[#allocation10 + $0xac] ss:$16 sps:$4 sm:$0xff]  }
 0x3c8   : > { %v1924_v32 = vmul.f32 %v1922_v4, %v1798_v11  ;;  %2023 = vmatpush1.bf16.msra.mxu0 %v4855_v59  ;;  %2064 = vmatpush1.bf16.msra.mxu1 %v4903_v34  ;;  %v4910_v59 = vld [vmem:[#allocation72_spill] sm:$0xff]  ;;  %v3253_v11 = vld [vmem:[#allocation10 + $0xcc] ss:$16 sps:$4 sm:$0xff]  }
 0x3c9   : > { %2024 = vmatprep.subr.bf16.mxu0 %v4904_v36  ;;  %2065 = vmatprep.subr.bf16.mxu1 %v4905_v38  ;;  %v3254_v4 = vld [vmem:[#allocation10 + $0xc0] ss:$16 sps:$4 sm:$0xff]   ;;  %v3260_v34 = vld [vmem:[#allocation10 + $0x84] ss:$16 sps:$4 sm:$0xff]   ;;  %v3261_v36 = vld [vmem:[#allocation10 + $0x8c] ss:$16 sps:$4 sm:$0xff]  }
 0x3ca   : > { %v4429_v35 = vadd.f32 %v1925_v33, %v1924_v32  ;;  %v3258_v32 = vld [vmem:[#allocation10 + $0xa0] ss:$16 sps:$4 sm:$0xff]   ;;  %v3259_v33 = vld [vmem:[#allocation10 + $0xa8] ss:$16 sps:$4 sm:$0xff]  }
 0x3cb   : > { %v3262_v38 = vld [vmem:[#allocation10 + $0x80] ss:$16 sps:$4 sm:$0xff]  }
 0x3cc   : > { %3174 = vtanh.f32 %v4429_v35  ;;  %2025 = vmatpush1.bf16.msra.mxu0 %v4859_v58  ;;  %2066 = vmatpush1.bf16.msra.mxu1 %v4906_v61  ;;  %v1928_v58 = vrot.slane %v3171_v9, 4  ;;  %v3250_v9 = vld [vmem:[#allocation10 + $0xe0] ss:$16 sps:$4 sm:$0xff]   ;;  %v3263_v61 = vld [vmem:[#allocation10 + $0x88] ss:$16 sps:$4 sm:$0xff]  }
 0x3cd   : > { %2026 = vmatprep.subr.bf16.mxu0 %v4907_v40  ;;  %2067 = vmatprep.subr.bf16.mxu1 %v4908_v43  ;;  %v3264_v40 = vld [vmem:[#allocation10 + $0x64] ss:$16 sps:$4 sm:$0xff]   ;;  %v3265_v43 = vld [vmem:[#allocation10 + $0x6c] ss:$16 sps:$4 sm:$0xff]  }
 0x3d0   : > { %2027 = vmatpush1.bf16.msra.mxu0 %v4909_v39  ;;  %2068 = vmatpush1.bf16.msra.mxu1 %v4910_v59  ;;  %v3266_v39 = vld [vmem:[#allocation10 + $0x60] ss:$16 sps:$4 sm:$0xff]   ;;  %v3267_v59 = vld [vmem:[#allocation10 + $0x68] ss:$16 sps:$4 sm:$0xff]  }
 0x3d1   : > { %2028 = vmatprep.subr.bf16.mxu0 %v4911_v41  ;;  %2069 = vmatprep.subr.bf16.mxu1 %v4866_v7  ;;  %v4916_v7 = vld [vmem:[#allocation31_spill] sm:$0xff]  ;;  %v3268_v41 = vld [vmem:[#allocation10 + $0x44] ss:$16 sps:$4 sm:$0xff]  }
 0x3d4   : > { %2029 = vmatpush1.bf16.msra.mxu0 %v4912_v44  ;;  %2070 = vmatpush1.bf16.msra.mxu1 %v4913_v45  ;;  %v3269_v44 = vld [vmem:[#allocation10 + $0x4c] ss:$16 sps:$4 sm:$0xff]   ;;  %v3270_v45 = vld [vmem:[#allocation10 + $0x40] ss:$16 sps:$4 sm:$0xff]  }
 0x3d5   : > { %2142 = vmatprep.subr.bf16.mxu0 %v4914_v46  ;;  %2183 = vmatprep.subr.bf16.mxu1 %v4278_v12  ;;  %v4918_v12 = vld [vmem:[#allocation33_spill] sm:$0xff] }
 0x3d6   : > { %v3271_v46 = vld [vmem:[#allocation10 + $0x48] ss:$16 sps:$4 sm:$0xff]  }
 0x3d9   : > { %v3175_v48 = vpop.eup %3174 }
 0x3da   : > { %v1930_v49 = vmul.f32 %v3175_v48, %v1928_v58  ;;  %v3272_v58 = vld [vmem:[#allocation10 + $0x24] ss:$16 sps:$4 sm:$0xff]   ;;  %v3273_v48 = vld [vmem:[#allocation10 + $0x2c] ss:$16 sps:$4 sm:$0xff]  }
 0x3dc   : > { %v2013_v50 = vpack.c.bf16 %v1930_v49, %v1930_v49 }
 0x3de   : > { %2047 = vmatmul.mubr.bf16.vlgmr.msra.gmra.mxu0 %v2013_v50  ;;  %2088 = vmatmul.mubr.bf16.vlgmr.msra.gmra.mxu1 %v2013_v50  ;;  %v3275_v50 = vld [vmem:[#allocation10 + $0x28] ss:$16 sps:$4 sm:$0xff]  }
 0x3df   : > { %2143 = vmatpush1.bf16.msra.mxu0 %v4281_v60  ;;  %2184 = vmatpush1.bf16.msra.mxu1 %v4284_v0  ;;  %v4922_v60 = vld [vmem:[#allocation37_spill] sm:$0xff]  ;;  %v4923_v0 = vld [vmem:[#allocation38_spill] sm:$0xff] }
 0x3e0   : > { %2144 = vmatprep.subr.bf16.mxu0 %v4915_v17  ;;  %2185 = vmatprep.subr.bf16.mxu1 %v4916_v7  ;;  %v3276_v17 = vld [vmem:[#allocation10 + $0x4] ss:$16 sps:$4 sm:$0xff]   ;;  %v3277_v7 = vld [vmem:[#allocation10 + $0xc] ss:$16 sps:$4 sm:$0xff]  }
 0x3e1   : > { %2174 = vmatprep.mubr.bf16.mxu0 %v4788_v37  ;;  %2215 = vmatprep.mubr.bf16.mxu1 %v4788_v37 }
 0x3e3   : > { %2145 = vmatpush1.bf16.msra.mxu0 %v4917_v18  ;;  %2186 = vmatpush1.bf16.msra.mxu1 %v4918_v12  ;;  %v3278_v18 = vld [vmem:[#allocation10] ss:$16 sps:$4 sm:$0xff]   ;;  %v3279_v12 = vld [vmem:[#allocation10 + $0x8] ss:$16 sps:$4 sm:$0xff]  }
 0x3e4   : > { %2146 = vmatprep.subr.bf16.mxu0 %v4919_v19  ;;  %2187 = vmatprep.subr.bf16.mxu1 %v4920_v20  ;;  %v3280_v19 = vld [vmem:[#allocation8 + $0xe4] ss:$16 sps:$4 sm:$0xff]   ;;  %v3281_v20 = vld [vmem:[#allocation8 + $0xec] ss:$16 sps:$4 sm:$0xff]  }
 0x3e7   : > { %2147 = vmatpush1.bf16.msra.mxu0 %v4921_v21  ;;  %2188 = vmatpush1.bf16.msra.mxu1 %v4922_v60 }
 0x3e8   : > { %2148 = vmatprep.subr.bf16.mxu0 %v4923_v0  ;;  %2189 = vmatprep.subr.bf16.mxu1 %v4924_v22 }
 0x3eb   : > { %2149 = vmatpush1.bf16.msra.mxu0 %v4925_v23  ;;  %2190 = vmatpush1.bf16.msra.mxu1 %v4926_v5 }
 0x3ec   : > { %2150 = vmatprep.subr.bf16.mxu0 %v4325_v63  ;;  %2191 = vmatprep.subr.bf16.mxu1 %v4328_v8  ;;  %v3242_v63 = vld [vmem:[#allocation7 + $0x20] ss:$16 sps:$4 sm:$0xff]   ;;  %v3243_v8 = vld [vmem:[#allocation7 + $0x28] ss:$16 sps:$4 sm:$0xff]  }
 0x3ef   : > { %2151 = vmatpush1.bf16.msra.mxu0 %v4927_v57  ;;  %2192 = vmatpush1.bf16.msra.mxu1 %v4334_v54  ;;  %v2133_v54 = vmul.f32 %v4468_v14, %v1930_v49  ;;  %v3274_v49 = vld [vmem:[#allocation10 + $0x20] ss:$16 sps:$4 sm:$0xff]  }
 0x3f0   : > { %2152 = vmatprep.subr.bf16.mxu0 %v4337_v13  ;;  %2193 = vmatprep.subr.bf16.mxu1 %v4928_v51  ;;  %v3245_v13 = vld [vmem:[#allocation7 + $0xc] ss:$16 sps:$4 sm:$0xff]  }
 0x3f1   : > { %v2141_v6 = vpack.c.bf16 %v2133_v54, %v2133_v54 }
 0x3f3   : > { %2153 = vmatpush1.bf16.msra.mxu0 %v3238_v15  ;;  %2194 = vmatpush1.bf16.msra.mxu1 %v3239_v52 }
 0x3f4   : > { %2154 = vmatprep.subr.bf16.mxu0 %v3240_v53  ;;  %2195 = vmatprep.subr.bf16.mxu1 %v3241_v3 }
 0x3f7   : > { %2155 = vmatpush1.bf16.msra.mxu0 %v3242_v63  ;;  %2196 = vmatpush1.bf16.msra.mxu1 %v3243_v8 }
 0x3f8   : > { %2156 = vmatprep.subr.bf16.mxu0 %v3244_v25  ;;  %2197 = vmatprep.subr.bf16.mxu1 %v3245_v13 }
 0x3fb   : > { %2157 = vmatpush1.bf16.msra.mxu0 %v3246_v26  ;;  %2198 = vmatpush1.bf16.msra.mxu1 %v3247_v27 }
 0x3fc   : > { %2267 = vmatprep.subr.bf16.mxu0 %v3248_v56  ;;  %2308 = vmatprep.subr.bf16.mxu1 %v3249_v2 }
 0x3fe   : > { %2175 = vmatmul.mubr.bf16.vlgmr.msra.gmra.mxu0 %v2141_v6  ;;  %2216 = vmatmul.mubr.bf16.vlgmr.msra.gmra.mxu1 %v2141_v6 }
 0x3ff   : > { %2268 = vmatpush1.bf16.msra.mxu0 %v3250_v9  ;;  %2309 = vmatpush1.bf16.msra.mxu1 %v3251_v28 }
 0x400   : > { %2269 = vmatprep.subr.bf16.mxu0 %v3252_v30  ;;  %2310 = vmatprep.subr.bf16.mxu1 %v3253_v11 }
 0x401   : > { %2299 = vmatprep.mubr.bf16.mxu0 %v4788_v37  ;;  %2340 = vmatprep.mubr.bf16.mxu1 %v4788_v37 }
 0x403   : > { %2270 = vmatpush1.bf16.msra.mxu0 %v3254_v4  ;;  %2311 = vmatpush1.bf16.msra.mxu1 %v3255_v42 }
 0x404   : > { %2271 = vmatprep.subr.bf16.mxu0 %v3256_v62  ;;  %2312 = vmatprep.subr.bf16.mxu1 %v3257_v31 }
 0x407   : > { %2272 = vmatpush1.bf16.msra.mxu0 %v3258_v32  ;;  %2313 = vmatpush1.bf16.msra.mxu1 %v3259_v33 }
 0x408   : > { %2273 = vmatprep.subr.bf16.mxu0 %v3260_v34  ;;  %2314 = vmatprep.subr.bf16.mxu1 %v3261_v36 }
 0x40b   : > { %2274 = vmatpush1.bf16.msra.mxu0 %v3262_v38  ;;  %2315 = vmatpush1.bf16.msra.mxu1 %v3263_v61  ;;  %v2829_v38 = vld [vmem:[%s3809_s3 + $0xc] sm:$0xf] }
 0x40c   : > { %2275 = vmatprep.subr.bf16.mxu0 %v3264_v40  ;;  %2316 = vmatprep.subr.bf16.mxu1 %v3265_v43 }
 0x40f   : > { %2276 = vmatpush1.bf16.msra.mxu0 %v3266_v39  ;;  %2317 = vmatpush1.bf16.msra.mxu1 %v3267_v59  ;;  %v1800_v59 = vmul.f32 %v4347_v55, %v4402_v24 }
 0x410   : > { %2277 = vmatprep.subr.bf16.mxu0 %v3268_v41  ;;  %2318 = vmatprep.subr.bf16.mxu1 %v3269_v44 }
 0x413   : > { %2278 = vmatpush1.bf16.msra.mxu0 %v3270_v45  ;;  %2319 = vmatpush1.bf16.msra.mxu1 %v3271_v46 }
 0x414   : > { %2279 = vmatprep.subr.bf16.mxu0 %v3272_v58  ;;  %2320 = vmatprep.subr.bf16.mxu1 %v3273_v48  ;;  %v2140_v58 = vunpack.c.l.bf16 %v2829_v38  ;;  %v4491_v38 = vpop.permute.xlu1 %2466 }
 0x417   : > { %2280 = vmatpush1.bf16.msra.mxu0 %v3274_v49  ;;  %2321 = vmatpush1.bf16.msra.mxu1 %v3275_v50 }
 0x418   : > { %2281 = vmatprep.subr.bf16.mxu0 %v3276_v17  ;;  %2322 = vmatprep.subr.bf16.mxu1 %v3277_v7 }
 0x41b   : > { %2282 = vmatpush1.bf16.msra.mxu0 %v3278_v18  ;;  %2323 = vmatpush1.bf16.msra.mxu1 %v3279_v12 }
 0x41c   : > { %2350 = vmatprep.subr.bf16.mxu0 %v3280_v19  ;;  %2391 = vmatprep.subr.bf16.mxu1 %v3281_v20 }
 0x477   : > { %v1965_v21 = vpop.f32.mrf.mxu0  ;;  %v2006_v60 = vpop.f32.mrf.mxu1 }
 0x478   : > { %v1966_v15 = vadd.f32 %v1965_v21, %v4892_v47  ;;  %v2007_v9 = vadd.f32 %v2006_v60, %v4894_v1 }
 0x479   : > { %v1967_v0 = vpop.f32.mrf.mxu0  ;;  %v2008_v22 = vpop.f32.mrf.mxu1 }
 0x47a   : > { %v1968_v3 = vadd.f32 %v1967_v0, %v4893_v16  ;;  %v2009_v30 = vadd.f32 %v2008_v22, %v4895_v10 }
 0x47b   : > { %v1969_v23 = vpop.f32.mrf.mxu0  ;;  %v2010_v5 = vpop.f32.mrf.mxu1 }
 0x47d   : > { %v1970_v57 = vpop.f32.mrf.mxu0  ;;  %v2011_v51 = vpop.f32.mrf.mxu1 }
 0x49e   : > { %v2048_v52 = vpop.f32.mrf.mxu0  ;;  %v2089_v53 = vpop.f32.mrf.mxu1 }
 0x49f   : > { %v2096_v63 = vadd.f32 %v2048_v52, %v1966_v15  ;;  %v2098_v28 = vadd.f32 %v2089_v53, %v2007_v9  ;;  %v3282_v15 = vld [vmem:[#allocation8 + $0xe0] ss:$16 sps:$4 sm:$0xff]   ;;  %v3283_v52 = vld [vmem:[#allocation8 + $0xe8] ss:$16 sps:$4 sm:$0xff]   ;;  %v3284_v53 = vld [vmem:[#allocation8 + $0xc4] ss:$16 sps:$4 sm:$0xff]   ;;  %v2134_v9 = vmul.f32 %v4468_v14, %v4429_v35 }
 0x4a0   : > { %v2050_v8 = vpop.f32.mrf.mxu0  ;;  %v2091_v54 = vpop.f32.mrf.mxu1 }
 0x4a1   : > { %v2824_v25 = vmul.f32 -1.442695, %v2096_v63  ;;  %v2097_v13 = vadd.f32 %v2050_v8, %v1968_v3  ;;  %v2826_v11 = vmul.f32 -1.442695, %v2098_v28  ;;  %v2099_v42 = vadd.f32 %v2091_v54, %v2009_v30  ;;  %v3285_v3 = vld [vmem:[#allocation8 + $0xcc] ss:$16 sps:$4 sm:$0xff]  }
 0x4a2   : > { %v2052_v26 = vpop.f32.mrf.mxu0  ;;  %v2093_v27 = vpop.f32.mrf.mxu1  ;;  %v3286_v63 = vld [vmem:[#allocation8 + $0xc0] ss:$16 sps:$4 sm:$0xff]   ;;  %v3287_v8 = vld [vmem:[#allocation8 + $0xc8] ss:$16 sps:$4 sm:$0xff]   ;;  %v3288_v54 = vld [vmem:[#allocation8 + $0xa4] ss:$16 sps:$4 sm:$0xff]  }
 0x4a3   : > { %3176 = vpow2.f32 %v2824_v25  ;;  %v2825_v6 = vmul.f32 -1.442695, %v2097_v13  ;;  %v3289_v25 = vld [vmem:[#allocation8 + $0xac] ss:$16 sps:$4 sm:$0xff]   ;;  %v3290_v13 = vld [vmem:[#allocation8 + $0xa0] ss:$16 sps:$4 sm:$0xff]  }
 0x4a4   : > { %v2053_v56 = vpop.f32.mrf.mxu0  ;;  %v2094_v2 = vpop.f32.mrf.mxu1  ;;  %v3291_v26 = vld [vmem:[#allocation8 + $0xa8] ss:$16 sps:$4 sm:$0xff]   ;;  %v3292_v27 = vld [vmem:[#allocation8 + $0x84] ss:$16 sps:$4 sm:$0xff]  }
 0x4a5   : > { %3178 = vpow2.f32 %v2825_v6  ;;  %v3293_v6 = vld [vmem:[#allocation8 + $0x8c] ss:$16 sps:$4 sm:$0xff]   ;;  %v3294_v2 = vld [vmem:[#allocation8 + $0x80] ss:$16 sps:$4 sm:$0xff]   ;;  %v3296_v30 = vld [vmem:[#allocation8 + $0x64] ss:$16 sps:$4 sm:$0xff]  }
 0x4a6   : > { %3180 = vpow2.f32 %v2826_v11  ;;  %v3297_v11 = vld [vmem:[#allocation8 + $0x6c] ss:$16 sps:$4 sm:$0xff]  }
 0x4b0   : > { %v3177_v4 = vpop.eup %3176 }
 0x4b1   : > { %v2109_v62 = vadd.f32 1.0, %v3177_v4 }
 0x4b2   : > { %v3179_v31 = vpop.eup %3178 }
 0x4b3   : > { %3182 = vrcp.f32 %v2109_v62  ;;  %v2110_v32 = vadd.f32 1.0, %v3179_v31  ;;  %v3181_v36 = vpop.eup %3180  ;;  %v3298_v31 = vld [vmem:[#allocation8 + $0x60] ss:$16 sps:$4 sm:$0xff]  }
 0x4b4   : > { %3184 = vtanh.f32 %v2099_v42  ;;  %v2111_v46 = vadd.f32 1.0, %v3181_v36  ;;  %v3301_v36 = vld [vmem:[#allocation8 + $0x4c] ss:$16 sps:$4 sm:$0xff]  }
 0x4b5   : > { %3186 = vrcp.f32 %v2110_v32  ;;  %v3299_v32 = vld [vmem:[#allocation8 + $0x68] ss:$16 sps:$4 sm:$0xff]  }
 0x4b6   : > { %3188 = vrcp.f32 %v2111_v46  ;;  %v3310_v46 = vld [vmem:[#allocation8] ss:$16 sps:$4 sm:$0xff]  }
 0x4be   : > { %v2176_v33 = vpop.f32.mrf.mxu0  ;;  %v2217_v34 = vpop.f32.mrf.mxu1 }
 0x4c0   : > { %v3183_v61 = vpop.eup %3182  ;;  %v2178_v40 = vpop.f32.mrf.mxu0 }
 0x4c1   : > { %v2219_v43 = vpop.f32.mrf.mxu1  ;;  %v3185_v39 = vpop.eup %3184  ;;  %v2228_v41 = vcombine.low %v2176_v33, %v2178_v40  ;;  %v3303_v40 = vld [vmem:[#allocation8 + $0x48] ss:$16 sps:$4 sm:$0xff]  }
 0x4c2   : > { %v2229_v44 = vcombine.low %v2217_v34, %v2219_v43  ;;  %v3187_v45 = vpop.eup %3186  ;;  %v2180_v48 = vpop.f32.mrf.mxu0  ;;  %v2120_v17 = vmul.f32 %v3185_v39, %v3183_v61  ;;  %v3300_v34 = vld [vmem:[#allocation8 + $0x44] ss:$16 sps:$4 sm:$0xff]   ;;  %v3302_v61 = vld [vmem:[#allocation8 + $0x40] ss:$16 sps:$4 sm:$0xff]   ;;  %v3305_v39 = vld [vmem:[#allocation8 + $0x2c] ss:$16 sps:$4 sm:$0xff]  }
 0x4c3   : > { %v2221_v49 = vpop.f32.mrf.mxu1  ;;  %v2119_v50 = vmul.f32 %v3187_v45, %v1800_v59  ;;  %v2236_v7 = vrot.slane %v2228_v41, %v4122_v29  ;;  %v3189_v60 = vpop.eup %3188  ;;  %v3304_v43 = vld [vmem:[#allocation8 + $0x24] ss:$16 sps:$4 sm:$0xff]   ;;  %v3306_v59 = vld [vmem:[#allocation8 + $0x20] ss:$16 sps:$4 sm:$0xff]   ;;  %v3307_v41 = vld [vmem:[#allocation8 + $0x28] ss:$16 sps:$4 sm:$0xff]  }
 0x4c4   : > { %v2243_v18 = vrot.slane %v2229_v44, %v4122_v29  ;;  %v2181_v12 = vpop.f32.mrf.mxu0  ;;  %v3308_v44 = vld [vmem:[#allocation8 + $0x4] ss:$16 sps:$4 sm:$0xff]   ;;  %v3309_v45 = vld [vmem:[#allocation8 + $0xc] ss:$16 sps:$4 sm:$0xff]  }
 0x4c5   : > { %v2222_v19 = vpop.f32.mrf.mxu1  ;;  %v4482_v20 = vadd.f32 %v2120_v17, %v2119_v50 }
 0x4c6   : > { %v2244_v21 = vcombine.low %v2236_v7, %v2243_v18 }
 0x4c7   : > { %3190 = vtanh.f32 %v4482_v20 }
 0x4c8   : > { %v2246_v55 = vadd.f32 %v2244_v21, %v2140_v58  ;;  %v3311_v58 = vld [vmem:[#allocation8 + $0x8] ss:$16 sps:$4 sm:$0xff]  }
 0x4ca   : > { %v2830_v24 = vmul.f32 -1.442695, %v2246_v55  ;;  %v2254_v29 = vrot.slane %v2246_v55, 6 }
 0x4cc   : > { %3192 = vpow2.f32 %v2830_v24 }
 0x4d4   : > { %v3191_v0 = vpop.eup %3190 }
 0x4d5   : > { %v2123_v22 = vmul.f32 %v3191_v0, %v3189_v60 }
 0x4d7   : > { %2827 = vst [vmem:[%s3816_s30 + $0x4] sm:$0x3] %v2123_v22  ;;  %v2135_v23 = vmul.f32 %v4468_v14, %v2123_v22 }
 0x4d9   : > { %v3193_v5 = vpop.eup %3192  ;;  %v2137_v51 = vpack.c.bf16 %v2135_v23, %v2135_v23 }
 0x4da   : > { %v2250_v57 = vadd.f32 1.0, %v3193_v5 }
 0x4db   : > { %2300 = vmatmul.mubr.bf16.vlgmr.msra.gmra.mxu0 %v2137_v51  ;;  %2341 = vmatmul.mubr.bf16.vlgmr.msra.gmra.mxu1 %v2137_v51 }
 0x4dc   : > { %3194 = vrcp.f32 %v2250_v57  ;;  %2351 = vmatpush1.bf16.msra.mxu0 %v3282_v15  ;;  %2392 = vmatpush1.bf16.msra.mxu1 %v3283_v52 }
 0x4dd   : > { %3196 = vtanh.f32 %v2254_v29  ;;  %2352 = vmatprep.subr.bf16.mxu0 %v3284_v53  ;;  %2393 = vmatprep.subr.bf16.mxu1 %v3285_v3 }
 0x4de   : > { %2382 = vmatprep.mubr.bf16.mxu0 %v4788_v37  ;;  %2423 = vmatprep.mubr.bf16.mxu1 %v4788_v37  ;;  %v3295_v37 = vld [vmem:[#allocation8 + $0x88] ss:$16 sps:$4 sm:$0xff]  }
 0x4e0   : > { %2353 = vmatpush1.bf16.msra.mxu0 %v3286_v63  ;;  %2394 = vmatpush1.bf16.msra.mxu1 %v3287_v8 }
 0x4e1   : > { %2354 = vmatprep.subr.bf16.mxu0 %v3288_v54  ;;  %2395 = vmatprep.subr.bf16.mxu1 %v3289_v25 }
 0x4e4   : > { %2355 = vmatpush1.bf16.msra.mxu0 %v3290_v13  ;;  %2396 = vmatpush1.bf16.msra.mxu1 %v3291_v26 }
 0x4e5   : > { %2356 = vmatprep.subr.bf16.mxu0 %v3292_v27  ;;  %2397 = vmatprep.subr.bf16.mxu1 %v3293_v6 }
 0x4e8   : > { %2357 = vmatpush1.bf16.msra.mxu0 %v3294_v2  ;;  %2398 = vmatpush1.bf16.msra.mxu1 %v3295_v37 }
 0x4e9   : > { %v3195_v56 = vpop.eup %3194  ;;  %2358 = vmatprep.subr.bf16.mxu0 %v3296_v30  ;;  %2399 = vmatprep.subr.bf16.mxu1 %v3297_v11 }
 0x4ea   : > { %v2258_v28 = vrot.slane %v3195_v56, 2  ;;  %v3197_v4 = vpop.eup %3196  ;;  %v2264_v48 = vrot.slane %v3195_v56, 4 }
 0x4eb   : > { %v2261_v62 = vmul.f32 %v3197_v4, %v3195_v56 }
 0x4ec   : > { %v2260_v42 = vmul.f32 %v2258_v28, %v2134_v9  ;;  %2359 = vmatpush1.bf16.msra.mxu0 %v3298_v31  ;;  %2400 = vmatpush1.bf16.msra.mxu1 %v3299_v32 }
 0x4ed   : > { %2360 = vmatprep.subr.bf16.mxu0 %v3300_v34  ;;  %2401 = vmatprep.subr.bf16.mxu1 %v3301_v36 }
 0x4ee   : > { %v2262_v33 = vadd.f32 %v2261_v62, %v2260_v42 }
 0x4f0   : > { %3198 = vtanh.f32 %v2262_v33  ;;  %v2470_v35 = vmul.f32 %v4491_v38, %v2262_v33  ;;  %2361 = vmatpush1.bf16.msra.mxu0 %v3302_v61  ;;  %2402 = vmatpush1.bf16.msra.mxu1 %v3303_v40 }
 0x4f1   : > { %2362 = vmatprep.subr.bf16.mxu0 %v3304_v43  ;;  %2403 = vmatprep.subr.bf16.mxu1 %v3305_v39 }
 0x4f2   : > { %2475 = vst [vmem:[#allocation14] sm:$0x3] %v2470_v35 }
 0x4f4   : > { %2363 = vmatpush1.bf16.msra.mxu0 %v3306_v59  ;;  %2404 = vmatpush1.bf16.msra.mxu1 %v3307_v41 }
 0x4f5   : > { %2364 = vmatprep.subr.bf16.mxu0 %v3308_v44  ;;  %2405 = vmatprep.subr.bf16.mxu1 %v3309_v45 }
 0x4f8   : > { %2365 = vmatpush1.bf16.msra.mxu0 %v3310_v46  ;;  %2406 = vmatpush1.bf16.msra.mxu1 %v3311_v58 }
 0x4fd   : > { %v3199_v49 = vpop.eup %3198 }
 0x4fe   : > { %v2266_v50 = vmul.f32 %v3199_v49, %v2264_v48 }
 0x500   : > { %v2349_v17 = vpack.c.bf16 %v2266_v50, %v2266_v50  ;;  %v2469_v7 = vmul.f32 %v4491_v38, %v2266_v50 }
 0x502   : > { %2383 = vmatmul.mubr.bf16.vlgmr.msra.gmra.mxu0 %v2349_v17  ;;  %2424 = vmatmul.mubr.bf16.vlgmr.msra.gmra.mxu1 %v2349_v17  ;;  %2473 = vst [vmem:[#allocation12] sm:$0x3] %v2469_v7 }
 0x59b   : > { %v2301_v18 = vpop.f32.mrf.mxu0  ;;  %v2342_v12 = vpop.f32.mrf.mxu1 }
 0x59c   : > { %v2302_v22 = vadd.f32 %v2301_v18, %v4892_v47  ;;  %v2343_v13 = vadd.f32 %v2342_v12, %v4894_v1  ;;  %v2136_v1 = vmul.f32 %v4468_v14, %v4482_v20 }
 0x59d   : > { %v2303_v19 = vpop.f32.mrf.mxu0  ;;  %v2344_v21 = vpop.f32.mrf.mxu1 }
 0x59e   : > { %v2304_v57 = vadd.f32 %v2303_v19, %v4893_v16  ;;  %v2345_v47 = vadd.f32 %v2344_v21, %v4895_v10 }
 0x59f   : > { %v2305_v55 = vpop.f32.mrf.mxu0  ;;  %v2346_v24 = vpop.f32.mrf.mxu1 }
 0x5a1   : > { %v2306_v60 = vpop.f32.mrf.mxu0  ;;  %v2347_v0 = vpop.f32.mrf.mxu1 }
 0x5c2   : > { %v2384_v23 = vpop.f32.mrf.mxu0  ;;  %v2425_v5 = vpop.f32.mrf.mxu1 }
 0x5c3   : > { %v2432_v29 = vadd.f32 %v2384_v23, %v2302_v22  ;;  %v2434_v26 = vadd.f32 %v2425_v5, %v2343_v13 }
 0x5c4   : > { %v2386_v51 = vpop.f32.mrf.mxu0  ;;  %v2427_v15 = vpop.f32.mrf.mxu1 }
 0x5c5   : > { %v2831_v52 = vmul.f32 -1.442695, %v2432_v29  ;;  %v2433_v53 = vadd.f32 %v2386_v51, %v2304_v57  ;;  %v2833_v27 = vmul.f32 -1.442695, %v2434_v26  ;;  %v2435_v16 = vadd.f32 %v2427_v15, %v2345_v47 }
 0x5c6   : > { %v2388_v3 = vpop.f32.mrf.mxu0  ;;  %v2429_v63 = vpop.f32.mrf.mxu1 }
 0x5c7   : > { %3200 = vpow2.f32 %v2831_v52  ;;  %v2832_v8 = vmul.f32 -1.442695, %v2433_v53 }
 0x5c8   : > { %v2389_v54 = vpop.f32.mrf.mxu0  ;;  %v2430_v25 = vpop.f32.mrf.mxu1 }
 0x5c9   : > { %3202 = vpow2.f32 %v2832_v8 }
 0x5ca   : > { %3204 = vpow2.f32 %v2833_v27 }
 0x5d4   : > { %v3201_v6 = vpop.eup %3200 }
 0x5d5   : > { %v2445_v56 = vadd.f32 1.0, %v3201_v6 }
 0x5d6   : > { %v3203_v2 = vpop.eup %3202 }
 0x5d7   : > { %3206 = vrcp.f32 %v2445_v56  ;;  %v2446_v37 = vadd.f32 1.0, %v3203_v2  ;;  %v3205_v9 = vpop.eup %3204 }
 0x5d8   : > { %3208 = vtanh.f32 %v2435_v16  ;;  %v2447_v10 = vadd.f32 1.0, %v3205_v9 }
 0x5d9   : > { %3210 = vrcp.f32 %v2446_v37 }
 0x5da   : > { %3212 = vrcp.f32 %v2447_v10 }
 0x5e4   : > { %v3207_v28 = vpop.eup %3206 }
 0x5e5   : > { %v3209_v30 = vpop.eup %3208 }
 0x5e6   : > { %v3211_v11 = vpop.eup %3210  ;;  %v2456_v42 = vmul.f32 %v3209_v30, %v3207_v28 }
 0x5e7   : > { %v2455_v4 = vmul.f32 %v3211_v11, %v2136_v1  ;;  %v3213_v32 = vpop.eup %3212 }
 0x5e9   : > { %v2457_v62 = vadd.f32 %v2456_v42, %v2455_v4 }
 0x5eb   : > { %3214 = vtanh.f32 %v2457_v62  ;;  %v2472_v31 = vmul.f32 %v4491_v38, %v2457_v62 }
 0x5ed   : > { %2476 = vst [vmem:[#allocation14 + $0x2] sm:$0x3] %v2472_v31 }
 0x5f8   : > { %v3215_v33 = vpop.eup %3214 }
 0x5f9   : > { %v2459_v14 = vmul.f32 %v3215_v33, %v3213_v32 }
 0x5fb   : > { %2834 = vst [vmem:[%s3816_s30 + $0x6] sm:$0x3] %v2459_v14  ;;  %v2471_v20 = vmul.f32 %v4491_v38, %v2459_v14 }
 0x5fc   : > { %3455 = shalt.err (!%p3452_p2)
}
 0x5fd   : > { %s3456_s15 = scalar_lea.hbm %s4507_s11, 128  ;;  %s3460_s12 = scalar_lea.hbm %s4600_s8, 256 }
 0x5fe   : > { %p3457_p12 = scmp.ne.s32.totalorder %s4507_s11, %s3456_s15  ;;  %p3461_p5 = scmp.lt.s32.totalorder %s4507_s11, %s4600_s8 }
 0x5ff   : > { %p3462_p10 = scmp.lt.s32.totalorder %s3460_s12, %s3456_s15 }
 0x600   : > { %p3458_p1 = pnand %p3457_p12, %p3701_p4 }
 0x601   : > { %p3463_p11 = por %p3462_p10, %p3461_p5 }
 0x602   : > { %p3459_p3 = pneg %p3458_p1 }
 0x604   : > { %p3464_p13 = pnand %p3463_p11, %p3459_p3 }
 0x606   : > { %3467 = shalt.err (!%p3464_p13)
}
 0x607   : > { %s3598_s3 = smov 32   ;;  %s3599_s26 = smov 2   ;;  %2474 = vst [vmem:[#allocation12 + $0x2] sm:$0x3] %v2471_v20 }
 0x608   : > { %2866 = dma.vmem_to_hbm [thread:$0]  (%p3701_p4), %s4509_s28, 128, %s4507_s11, %s4519_s16, %s3598_s3, %s3598_s3, %s3599_s26  }
 0x609   : > { %s3468_s29 = scalar_lea.vmem %s4513_s19, 64  ;;  %p4929_p6 = scmp.ne.s32.totalorder %s4745_s23, 0 }
 0x60a   : > { %p3469_p0 = scmp.ne.s32.totalorder %s4513_s19, %s3468_s29  ;;  %p3475_p9 = scmp.lt.s32.totalorder %s4513_s19, %s4513_s19 }
 0x60b   : > { %p3476_p2 = scmp.lt.s32.totalorder %s3468_s29, %s3468_s29 }
 0x60c   : > { %p3470_p7 = pnand %p3469_p0, %p4929_p6 }
 0x60d   : > { %p3477_p12 = por %p3476_p2, %p3475_p9 }
 0x60e   : > { %p3471_p8 = pneg %p3470_p7 }
 0x610   : > { %p3478_p1 = pnand %p3477_p12, %p3471_p8 }
 0x612   : > { %3481 = shalt.err (!%p3478_p1)
}
 0x613   : > { %2868 = dma.vmem_to_hbm [thread:$0]  (%p4929_p6), %s4513_s19, 64, %s4601_s9, [#allocation13], %s3598_s3, %s3598_s3, %s3599_s26  }
 0x614   : > { %s3492_s24 = scalar_lea.vmem %s4515_s21, 64  ;;  %p3499_p10 = scmp.lt.s32.totalorder %s4515_s21, %s4515_s21 }
 0x615   : > { %p3493_p4 = scmp.ne.s32.totalorder %s4515_s21, %s3492_s24  ;;  %p3500_p11 = scmp.lt.s32.totalorder %s3492_s24, %s3492_s24 }
 0x617   : > { %p3494_p3 = pnand %p3493_p4, %p4929_p6  ;;  %p3501_p13 = por %p3500_p11, %p3499_p10 }
 0x619   : > { %p3495_p5 = pneg %p3494_p3 }
 0x61b   : > { %p3502_p0 = pnand %p3501_p13, %p3495_p5 }
 0x61d   : > { %3505 = shalt.err (!%p3502_p0)
}
 0x61e   : > { %2870 = dma.vmem_to_hbm [thread:$0]  (%p4929_p6), %s4515_s21, 64, %s4602_s10, [#allocation13], %s3598_s3, %s3598_s3, %s3599_s26  }
 0x61f   : > { %3553 = dma.done.wait (%p4929_p6), [#allocation13], 128  }
 0x620   : > { %3555 = vsyncadd (%p4929_p6), [#allocation13], 4294967168 }
 0x621 PF: > { %s4930_s19 = sld [smem:[#allocation23_spill]]  ;;  %p2910_p7 = scmp.ge.s32.totalorder %s3582_s18, 2 }
 0x622   : > { %s2545_s16 = sand.u32 1, %s3562_s13  }
 0x623   : > { %s2546_s15 = scalar_lea.sflag [#allocation4], %s2545_s16 }
 0x627   : > { %p4931_p8 = scmp.ne.s32.totalorder %s4930_s19, 0 }
 0x629   : > { %p2893_p9 = pnand %p2910_p7, %p4931_p8 }
 0x62b   : > { %p2894_p2 = pneg %p2893_p9 }
 0x62d   : > { %3557 = dma.done.wait (%p2894_p2), %s2546_s15, 128  }
 0x62e   : > { %3559 = vsyncadd (%p2894_p2), %s2546_s15, 4294967168  ;;  %s28_s18 = sadd.s32 1, %s3582_s18   ;;  %s4932_s21 = sld [smem:[#allocation20_spill]] }
 0x62f   : > { %p25_p12 = scmp.ge.s32.totalorder %s28_s18, 4   ;;  %s4933_s15 = sld [smem:[#allocation24_spill]] }
 0x630   : > { %s4934_s16 = sld [smem:[#allocation21_spill]]  ;;  %s4936_s13 = smov %s3566_s14 }
 0x631   : > { %s4935_s17 = sld [smem:[#allocation22_spill]]  ;;  %27 = sbr.rel (!%p25_p12) target bundleno = 10 (0xa), region = 146 }
 0x634   : > { %s4937_s14 = smov %s4932_s21 }
 0x636   :  { %2551 = vsyncpa [#allocation3], 1 }
 0x637   :  { %2553 = vsyncpa [#allocation3 + $0x1], 1 }
 0x638   :  { %2554 = vsyncpa [#allocation6], 1 }
 0x639   :  { %2555 = vsyncpa [#allocation9], 1 }
 0x63a   :  { %2556 = vsyncpa [#allocation4], 1 }
 0x63b   :  { %2558 = vsyncpa [#allocation4 + $0x1], 1 }
 0x63c   :  { %2559 = vsyncpa [#allocation13], 1 }

</bundles_post_ra>
